<compile_context>
chip_gen: v7x
topology: tpu7x:2x2x1
jax: 0.10.0
libtpu: 0.0.40
codegen_flags: <defaults>
</compile_context>

<pallas_src>
import functools

import jax
import jax.numpy as jnp
from jax import lax
from jax.experimental import pallas as pl
from jax.experimental.pallas import tpu as pltpu

COV_NUM = 3
NEG_SLOPE = 0.2      # GATConv default LeakyReLU slope
LN_EPS = 1e-5        # nn.LayerNorm default eps
MASK_VAL = -1e30     # non-edge sentinel; do NOT shrink (relies on exp underflow after max-sub)


def _round_up(x, m):
    return ((x + m - 1) // m) * m


# -----------------------------------------------------------------------------
# Kernel
# -----------------------------------------------------------------------------
def gnn_kernel(H,                      # real (unpadded) hidden dim, static
               # inputs
               x0_hbm, ealpha_ref, pool_ref,
               wlin_ref, attds_ref, bgat_ref, gamma_ref, beta_ref,
               # outputs
               gemb_ref,
               # scratch (persists across the whole grid)
               xl_sc, xs_sc, asrc_sc):
    f32 = jnp.float32
    l = pl.program_id(0)
    t = pl.program_id(1)
    num_layers = pl.num_programs(0)

    TM = ealpha_ref.shape[1]
    HP = wlin_ref.shape[2]

    # ---- very first grid step: DMA the wrapper-projected node state into scratch, zero output.
    @pl.when(jnp.logical_and(l == 0, t == 0))
    def _init():
        pltpu.sync_copy(x0_hbm, xs_sc)                 # x^(0) = initial_proj(x) (computed in XLA)
        gemb_ref[...] = jnp.zeros_like(gemb_ref)

    # ---- per-layer precompute (once, at tile 0): shared projection xl = x @ W_l and the
    #      per-source attention logits as a lane-major (1, NP) row (broadcast-added per tile).
    @pl.when(t == 0)
    def _layer_pre():
        xl = jnp.dot(xs_sc[...], wlin_ref[0], preferred_element_type=f32)        # [NP, HP]
        xl_sc[...] = xl                            # x is dead for the rest of the layer
        att_src = attds_ref[0][1:2, :]                                            # (1, HP)
        asrc_sc[...] = lax.dot_general(att_src, xl, (((1,), (1,)), ((), ())),
                                       preferred_element_type=f32)                # (1, NP)

    # ---- this row tile of target nodes.
    row0 = pl.multiple_of(t * TM, TM)
    ea_t = ealpha_ref[0].astype(f32)                   # (TM, NP) bf16 -> f32 (mask pre-folded)
    xl_rows = xl_sc[pl.ds(row0, TM), :]                # (TM, HP)
    att_dst = attds_ref[0][0:1, :]                     # (1, HP)
    a_dst = lax.dot_general(xl_rows, att_dst, (((1,), (1,)), ((), ())),
                            preferred_element_type=f32)                           # (TM, 1)

    alpha = (ea_t + a_dst) + asrc_sc[...]              # lane- then sublane-broadcast add (VPU)
    alpha = jnp.where(alpha >= 0, alpha, NEG_SLOPE * alpha)                       # LeakyReLU
    m = jnp.max(alpha, axis=1, keepdims=True)
    ex = jnp.exp(alpha - m)                            # masked entries underflow to exactly 0
    denom = jnp.sum(ex, axis=1, keepdims=True)
    attn = ex * pl.reciprocal(denom, approx=False)     # exact: keeps 1e-4 parity w/ f32 ref

    out = jnp.dot(attn, xl_sc[...], preferred_element_type=f32) + bgat_ref[0]     # [TM, HP]

    # LayerNorm over the real H lanes.  Pad lanes of `out` are exactly 0, so instead of a lane
    # mask we subtract the pad lanes' (HP - H) * mu^2 contribution from the variance; pad lanes
    # of xnew come out 0 because gamma/beta pad lanes are 0.
    inv_h = 1.0 / H
    mu = jnp.sum(out, axis=1, keepdims=True) * inv_h
    cen = out - mu
    var = (jnp.sum(cen * cen, axis=1, keepdims=True) - (HP - H) * mu * mu) * inv_h
    xnew = jnp.maximum(cen * lax.rsqrt(var + LN_EPS) * gamma_ref[0] + beta_ref[0], 0.0)
    # TODO(synk): nn.Dropout is identity at eval time; train-mode stochastic dropout not modeled.
    xs_sc[pl.ds(row0, TM), :] = xnew                   # overwrite dead x rows with x^(l+1)

    # ---- last layer: accumulate the global mean pool tile-by-tile (no serial tail).
    @pl.when(l == num_layers - 1)
    def _pool():
        gemb_ref[...] += jnp.dot(pool_ref[...], xnew, preferred_element_type=f32)


# -----------------------------------------------------------------------------
# Graph densification (shared by kernel wrapper and reference)
# -----------------------------------------------------------------------------
def build_masked_logits(edge_index, edge_attr, v, num_nodes, n_pad):
    """Pre-contracted, pre-masked GAT edge-attention logits in bf16.

    e[l, dst, src] = edge_attr(dst<-src) . v[l]   for real edges,
                     mean over incoming edges     for self loops (PyG add_self_loops fill='mean'),
                     MASK_VAL                     for non-edges and padded rows/columns.
    The adjacency mask is folded in, so no separate adj tensor is streamed."""
    src, dst = edge_index[0], edge_index[1]
    N = num_nodes
    L = v.shape[0]
    idx = jnp.arange(N)
    s = edge_attr.astype(jnp.float32) @ v.T                                   # [num_edges, L]
    e = jnp.full((L, n_pad, n_pad), MASK_VAL, jnp.float32)
    e = e.at[:, dst, src].set(s.T)
    sums = jnp.zeros((N, L), jnp.float32).at[dst].add(s)
    cnt = jnp.zeros((N,), jnp.float32).at[dst].add(1.0)
    loop_s = sums / jnp.maximum(cnt, 1.0)[:, None]                            # mean fill
    e = e.at[:, idx, idx].set(loop_s.T)
    return e.astype(jnp.bfloat16)


def make_pool_matrix(batch, num_graphs, g_pad, n_pad):
    onehot = (batch[None, :] == jnp.arange(num_graphs)[:, None]).astype(jnp.float32)  # [G, N]
    pool = onehot / jnp.maximum(jnp.sum(onehot, axis=1, keepdims=True), 1.0)
    return jnp.pad(pool, ((0, g_pad - num_graphs), (0, n_pad - batch.shape[0])))


def init_params(key, num_node_features, num_edge_features, num_global_features, hidden_dim):
    ks = jax.random.split(key, 10)
    s = 0.2
    L, H, E, G32 = COV_NUM, hidden_dim, num_edge_features, 32
    return dict(
        w0=jax.random.normal(ks[0], (num_node_features, H), jnp.float32) * s,
        b0=jax.random.normal(ks[1], (1, H), jnp.float32) * s,
        wlin=jax.random.normal(ks[2], (L, H, H), jnp.float32) * s,
        asrc=jax.random.normal(ks[3], (L, H, 1), jnp.float32) * s,
        adst=jax.random.normal(ks[4], (L, H, 1), jnp.float32) * s,
        aedge=jax.random.normal(ks[5], (L, 1, H), jnp.float32) * s,
        wedge=jax.random.normal(ks[6], (L, E, H), jnp.float32) * s,
        bgat=jax.random.normal(ks[7], (L, 1, H), jnp.float32) * s,
        gamma=jnp.ones((L, 1, H), jnp.float32),
        beta=jnp.zeros((L, 1, H), jnp.float32),
        wg=jax.random.normal(ks[8], (num_global_features, G32), jnp.float32) * s,
        bg=jax.random.normal(ks[9], (1, G32), jnp.float32) * s,
    )


# -----------------------------------------------------------------------------
# Wrapper
# -----------------------------------------------------------------------------
@functools.partial(jax.jit, static_argnames=("num_graphs", "row_tile"))
def gnn_forward(x, edge_index, edge_attr, batch, global_features, params, *,
                num_graphs, row_tile=256):
    f32 = jnp.float32
    N = x.shape[0]
    H = params["w0"].shape[1]
    L = params["wlin"].shape[0]

    HP = _round_up(H, 128)                            # lane-dense hidden dim
    GPAD = _round_up(num_graphs, 8)
    n16 = _round_up(N, 16)                            # bf16 sublane packing
    if n16 <= row_tile:
        TM = n16                                      # single row tile (blocks == full dims)
    else:
        TM = max(128, (int(row_tile) // 128) * 128)   # multi-tile: keep (x,128)-aligned blocks
    NP = _round_up(N, TM)
    T = NP // TM

    # --- plain-XLA pieces moved out of the kernel: initial projection, global encoder,
    #     edge-attention pre-contraction, masked dense logits, pool matrix.
    x0 = x.astype(f32) @ params["w0"] + params["b0"]                          # [N, H]
    glob = global_features.astype(f32) @ params["wg"] + params["bg"]          # [G, 32]
    v = jnp.sum(params["wedge"] * params["aedge"], axis=2)                    # [L, E]
    e_alpha = build_masked_logits(edge_index, edge_attr, v, N, NP)            # bf16 [L, NP, NP]
    pool = make_pool_matrix(batch, num_graphs, GPAD, NP)                      # f32 [GPAD, NP]

    def pad(a, shape):
        return jnp.pad(a.astype(f32), [(0, s - d) for d, s in zip(a.shape, shape)])

    x0_p = pad(x0, (NP, HP))
    wlin_p = pad(params["wlin"], (L, HP, HP))
    att2 = jnp.stack([params["adst"][:, :, 0], params["asrc"][:, :, 0]], axis=1)   # [L, 2, H]
    attds_p = pad(att2, (L, 8, HP))                   # row 0 = att_dst, row 1 = att_src
    bgat_p = pad(params["bgat"], (L, 1, HP))
    gamma_p = pad(params["gamma"], (L, 1, HP))
    beta_p = pad(params["beta"], (L, 1, HP))

    # VMEM footprint (bytes): two resident NPxHP buffers + a_src row + double-buffered streamed
    # tiles + per-layer params + resident output.  Sized with headroom and clamped to 32..48 MiB
    # (inside v7x's 64 MiB physical VMEM); raised only if the footprint truly demands more.
    footprint = (2 * NP * HP * 4 + 8 * NP * 4
                 + 2 * TM * NP * 2 + 2 * GPAD * TM * 4
                 + 2 * (HP * HP + 8 * HP + 3 * 8 * 128) * 4
                 + 2 * GPAD * HP * 4)
    need = int(footprint * 1.25) + (4 << 20)
    vmem_limit = max(32 << 20, need)
    vmem_limit = min(vmem_limit, max(48 << 20, need))

    kernel = functools.partial(gnn_kernel, H)

    grid_spec = pltpu.PrefetchScalarGridSpec(
        num_scalar_prefetch=0,
        grid=(L, T),
        in_specs=[
            pl.BlockSpec(memory_space=pl.ANY),                     # x0: DMA'd once at init
            pl.BlockSpec((1, TM, NP), lambda l, t: (l, t, 0)),     # masked bf16 logits row tile
            pl.BlockSpec((GPAD, TM), lambda l, t: (0, t)),         # pool column tile
            pl.BlockSpec((1, HP, HP), lambda l, t: (l, 0, 0)),     # GAT lin W[l]
            pl.BlockSpec((1, 8, HP), lambda l, t: (l, 0, 0)),      # [att_dst; att_src][l]
            pl.BlockSpec((1, 1, HP), lambda l, t: (l, 0, 0)),      # GAT bias[l]
            pl.BlockSpec((1, 1, HP), lambda l, t: (l, 0, 0)),      # LN gamma[l]
            pl.BlockSpec((1, 1, HP), lambda l, t: (l, 0, 0)),      # LN beta[l]
        ],
        out_specs=pl.BlockSpec((GPAD, HP), lambda l, t: (0, 0)),   # pooled graph embedding
        scratch_shapes=[
            pltpu.VMEM((NP, HP), f32),     # xl    (shared src/dst projection, current layer)
            pltpu.VMEM((NP, HP), f32),     # x     (node state; rows overwritten with x^(l+1))
            pltpu.VMEM((1, NP), f32),      # per-source attention logit row
        ],
    )

    gemb_p = pl.pallas_call(
        kernel,
        out_shape=jax.ShapeDtypeStruct((GPAD, HP), f32),
        grid_spec=grid_spec,
        compiler_params=pltpu.CompilerParams(
            # Layer axis carries the x -> x' dependency; the row-tile axis shares per-layer
            # xl / a_src scratch computed at t == 0 and accumulates into the resident output.
            # TODO(synk): on v7x the row-tile axis could be core-sharded (core_map + barrier).
            dimension_semantics=("arbitrary", "arbitrary"),
            vmem_limit_bytes=vmem_limit,
        ),
    )(x0_p, e_alpha, pool, wlin_p, attds_p, bgat_p, gamma_p, beta_p)

    return jnp.concatenate([gemb_p[:num_graphs, :H], glob], axis=1)


# -----------------------------------------------------------------------------
# Pure-JAX reference (same semantics, unpadded) for a numerical sanity check.
# Uses the same bf16-quantized streamed logits so the 1e-4 assert checks the kernel arithmetic;
# the bf16 storage of the edge-attention logits is the deliberate perf/accuracy trade-off.
# -----------------------------------------------------------------------------
def gnn_forward_reference(x, edge_index, edge_attr, batch, global_features, params, *, num_graphs):
    N = x.shape[0]
    L = params["wlin"].shape[0]
    v = jnp.sum(params["wedge"] * params["aedge"], axis=2)
    e_alpha = build_masked_logits(edge_index, edge_attr, v, N, N).astype(jnp.float32)
    pool = make_pool_matrix(batch, num_graphs, num_graphs, N)
    h = x @ params["w0"] + params["b0"]
    for l in range(L):
        xl = h @ params["wlin"][l]
        a_dst = xl @ params["adst"][l]
        a_src = (xl @ params["asrc"][l])[:, 0]
        alpha = a_dst + a_src[None, :] + e_alpha[l]
        alpha = jnp.where(alpha >= 0, alpha, NEG_SLOPE * alpha)
        ex = jnp.exp(alpha - jnp.max(alpha, axis=1, keepdims=True))
        attn = ex / jnp.sum(ex, axis=1, keepdims=True)
        out = attn @ xl + params["bgat"][l]
        mu = jnp.mean(out, axis=1, keepdims=True)
        var = jnp.mean((out - mu) ** 2, axis=1, keepdims=True)
        h = jnp.maximum((out - mu) / jnp.sqrt(var + LN_EPS) * params["gamma"][l]
                        + params["beta"][l], 0.0)
    g_emb = pool @ h
    glob = global_features @ params["wg"] + params["bg"]
    return jnp.concatenate([g_emb, glob], axis=1)


if __name__ == "__main__":
    # small synthetic problem: 2 graphs x 120 nodes, ring edges in both directions.
    # N=240 < NP=256 so padded rows/columns AND 2 row tiles per layer are exercised.
    num_node_features = 10
    num_edge_features = 6
    num_global_features = 5
    hidden_dim = 32
    num_graphs = 2
    nodes_per_graph = 120
    N = num_graphs * nodes_per_graph

    key = jax.random.PRNGKey(0)
    k_x, k_e, k_g, k_p = jax.random.split(key, 4)

    src_list, dst_list = [], []
    for g in range(num_graphs):
        base = g * nodes_per_graph
        for i in range(nodes_per_graph):
            j = (i + 1) % nodes_per_graph
            src_list += [base + i, base + j]
            dst_list += [base + j, base + i]
    edge_index = jnp.array([src_list, dst_list], dtype=jnp.int32)             # [2, 480]
    num_edges = edge_index.shape[1]

    x = jax.random.normal(k_x, (N, num_node_features), jnp.float32)
    edge_attr = jax.random.normal(k_e, (num_edges, num_edge_features), jnp.float32)
    global_features = jax.random.normal(k_g, (num_graphs, num_global_features), jnp.float32)
    batch = jnp.repeat(jnp.arange(num_graphs, dtype=jnp.int32), nodes_per_graph)

    params = init_params(k_p, num_node_features, num_edge_features,
                         num_global_features, hidden_dim)

    # row_tile=128 -> TM=128, NP=256, grid=(3 layers, 2 row tiles).
    out = gnn_forward(x, edge_index, edge_attr, batch, global_features, params,
                      num_graphs=num_graphs, row_tile=128)
    out = jax.block_until_ready(out)

    ref = gnn_forward_reference(x, edge_index, edge_attr, batch, global_features, params,
                                num_graphs=num_graphs)
    assert out.shape == (num_graphs, hidden_dim + 32)
    assert jnp.allclose(out, ref, rtol=1e-4, atol=1e-4), "Pallas kernel mismatch vs JAX reference"

    print("KERNEL_OK")
</pallas_src>

<mosaic_0001>
module attributes {stable_mosaic.version = 11 : i64} {
  func.func private @main(%arg0: i32) attributes {dimension_semantics = [#tpu.dimension_semantics<core_parallel>], iteration_bounds = array<i64: 2>, tpu.core_type = #tpu.core_type<sc_scalar_subcore>, window_params = []} {
    return
  }
}

module attributes {stable_mosaic.version = 11 : i64} {
  func.func private @main(%arg0: i32) attributes {dimension_semantics = [#tpu.dimension_semantics<core_parallel>], iteration_bounds = array<i64: 2>, tpu.core_type = #tpu.core_type<sc_scalar_subcore>, window_params = []} {
    return
  }
}

module attributes {stable_mosaic.version = 11 : i64} {
  func.func @gnn_kernel(%arg0: i32, %arg1: i32, %arg2: memref<256x128xf32, #tpu.memory_space<any>>, %arg3: memref<1x128x256xbf16, #tpu.memory_space<vmem>>, %arg4: memref<8x128xf32, #tpu.memory_space<vmem>>, %arg5: memref<1x128x128xf32, #tpu.memory_space<vmem>>, %arg6: memref<1x8x128xf32, #tpu.memory_space<vmem>>, %arg7: memref<1x1x128xf32, #tpu.memory_space<vmem>>, %arg8: memref<1x1x128xf32, #tpu.memory_space<vmem>>, %arg9: memref<1x1x128xf32, #tpu.memory_space<vmem>>, %arg10: memref<8x128xf32, #tpu.memory_space<vmem>>, %arg11: memref<256x128xf32, #tpu.memory_space<vmem>>, %arg12: memref<256x128xf32, #tpu.memory_space<vmem>>, %arg13: memref<1x256xf32, #tpu.memory_space<vmem>>) attributes {dimension_semantics = [#tpu.dimension_semantics<arbitrary>, #tpu.dimension_semantics<arbitrary>], iteration_bounds = array<i64: 3, 2>, scalar_prefetch = 0 : i64, scratch_operands = 3 : i64, tpu.core_type = #tpu.core_type<tc>, window_params = [{}, {transform_indices = @transform_1, window_bounds = array<i64: 1, 128, 256>}, {transform_indices = @transform_2, window_bounds = array<i64: 8, 128>}, {transform_indices = @transform_3, window_bounds = array<i64: 1, 128, 128>}, {transform_indices = @transform_4, window_bounds = array<i64: 1, 8, 128>}, {transform_indices = @transform_5, window_bounds = array<i64: 1, 1, 128>}, {transform_indices = @transform_6, window_bounds = array<i64: 1, 1, 128>}, {transform_indices = @transform_7, window_bounds = array<i64: 1, 1, 128>}, {pipeline_mode = #tpu.pipeline_mode<synchronous>, transform_indices = @transform_8, window_bounds = array<i64: 8, 128>}]} {
    %c0_i32 = arith.constant 0 : i32
    %0 = arith.cmpi eq, %arg0, %c0_i32 : i32
    %c0_i32_0 = arith.constant 0 : i32
    %1 = arith.cmpi eq, %arg1, %c0_i32_0 : i32
    %2 = arith.andi %0, %1 : i1
    %3 = arith.extui %2 : i1 to i32
    %c0_i32_1 = arith.constant 0 : i32
    %4 = arith.cmpi ne, %3, %c0_i32_1 : i32
    scf.if %4 {
      "tpu.region"() ({
        %82 = tpu.sem_alloc : memref<!tpu.dma_semaphore, #tpu.memory_space<semaphore_mem>>
        tpu.enqueue_dma source(%arg2 : memref<256x128xf32, #tpu.memory_space<any>>) target(%arg12 : memref<256x128xf32, #tpu.memory_space<vmem>>) target_semaphore(%82 : memref<!tpu.dma_semaphore, #tpu.memory_space<semaphore_mem>>)
        tpu.wait_dma2 semaphore(%82 : memref<!tpu.dma_semaphore, #tpu.memory_space<semaphore_mem>>) src(%arg2 : memref<256x128xf32, #tpu.memory_space<any>>) dst(%arg12 : memref<256x128xf32, #tpu.memory_space<vmem>>)
        tpu.yield
      }) : () -> ()
      %cst_37 = arith.constant 0.000000e+00 : f32
      %80 = vector.broadcast %cst_37 : f32 to vector<8x128xf32>
      %c0_38 = arith.constant 0 : index
      %c0_39 = arith.constant 0 : index
      %81 = vector.load %arg10[%c0_38, %c0_39] : memref<8x128xf32, #tpu.memory_space<vmem>>, vector<8x128xf32>
      tpu.vector_store %arg10[%c0_38, %c0_39], %80 {strides = array<i32>} : memref<8x128xf32, #tpu.memory_space<vmem>>, vector<8x128xf32>,
    } else {
    }
    %c0_i32_2 = arith.constant 0 : i32
    %5 = arith.cmpi eq, %arg1, %c0_i32_2 : i32
    %6 = arith.extui %5 : i1 to i32
    %c0_i32_3 = arith.constant 0 : i32
    %7 = arith.cmpi ne, %6, %c0_i32_3 : i32
    scf.if %7 {
      %c0_37 = arith.constant 0 : index
      %c0_38 = arith.constant 0 : index
      %80 = vector.load %arg12[%c0_37, %c0_38] : memref<256x128xf32, #tpu.memory_space<vmem>>, vector<256x128xf32>
      %c0_39 = arith.constant 0 : index
      %c0_40 = arith.constant 0 : index
      %c0_41 = arith.constant 0 : index
      %81 = vector.load %arg5[%c0_39, %c0_40, %c0_41] : memref<1x128x128xf32, #tpu.memory_space<vmem>>, vector<1x128x128xf32>
      %82 = vector.shape_cast %81 : vector<1x128x128xf32> to vector<128x128xf32>
      %cst_42 = arith.constant dense<0.000000e+00> : vector<256x128xf32>
      %83 = tpu.matmul %80, %82, %cst_42 {dimension_numbers = #tpu.dot_dimension_numbers<[1], [0], [0], [1], [0, 0, 1, 1], [], []>} : vector<256x128xf32>, vector<128x128xf32>, vector<256x128xf32> -> vector<256x128xf32>
      %c0_43 = arith.constant 0 : index
      %c0_44 = arith.constant 0 : index
      %84 = vector.load %arg11[%c0_43, %c0_44] : memref<256x128xf32, #tpu.memory_space<vmem>>, vector<256x128xf32>
      tpu.vector_store %arg11[%c0_43, %c0_44], %83 {strides = array<i32>} : memref<256x128xf32, #tpu.memory_space<vmem>>, vector<256x128xf32>,
      %c0_45 = arith.constant 0 : index
      %c0_46 = arith.constant 0 : index
      %c0_47 = arith.constant 0 : index
      %85 = vector.load %arg6[%c0_45, %c0_46, %c0_47] : memref<1x8x128xf32, #tpu.memory_space<vmem>>, vector<1x8x128xf32>
      %86 = vector.shape_cast %85 : vector<1x8x128xf32> to vector<8x128xf32>
      %87 = vector.extract_strided_slice %86 {offsets = [1, 0], sizes = [1, 128], strides = [1, 1]} : vector<8x128xf32> to vector<1x128xf32>
      %cst_48 = arith.constant dense<0.000000e+00> : vector<1x256xf32>
      %88 = tpu.matmul %87, %83, %cst_48 {dimension_numbers = #tpu.dot_dimension_numbers<[1], [1], [0], [0], [0, 0, 1, 0], [], []>} : vector<1x128xf32>, vector<256x128xf32>, vector<1x256xf32> -> vector<1x256xf32>
      %c0_49 = arith.constant 0 : index
      %c0_50 = arith.constant 0 : index
      %89 = vector.load %arg13[%c0_49, %c0_50] : memref<1x256xf32, #tpu.memory_space<vmem>>, vector<1x256xf32>
      tpu.vector_store %arg13[%c0_49, %c0_50], %88 {strides = array<i32>} : memref<1x256xf32, #tpu.memory_space<vmem>>, vector<1x256xf32>,
    } else {
    }
    %c128_i32 = arith.constant 128 : i32
    %8 = arith.muli %arg1, %c128_i32 : i32
    %9 = tpu.assume_multiple %8, 128 : i32
    %c0 = arith.constant 0 : index
    %c0_4 = arith.constant 0 : index
    %c0_5 = arith.constant 0 : index
    %10 = vector.load %arg3[%c0, %c0_4, %c0_5] : memref<1x128x256xbf16, #tpu.memory_space<vmem>>, vector<1x128x256xbf16>
    %11 = vector.shape_cast %10 : vector<1x128x256xbf16> to vector<128x256xbf16>
    %12 = arith.extf %11 : vector<128x256xbf16> to vector<128x256xf32>
    %13 = arith.index_cast %9 : i32 to index
    %c0_6 = arith.constant 0 : index
    %14 = vector.load %arg11[%13, %c0_6] : memref<256x128xf32, #tpu.memory_space<vmem>>, vector<128x128xf32>
    %c0_7 = arith.constant 0 : index
    %c0_8 = arith.constant 0 : index
    %c0_9 = arith.constant 0 : index
    %15 = vector.load %arg6[%c0_7, %c0_8, %c0_9] : memref<1x8x128xf32, #tpu.memory_space<vmem>>, vector<1x8x128xf32>
    %16 = vector.shape_cast %15 : vector<1x8x128xf32> to vector<8x128xf32>
    %17 = vector.extract_strided_slice %16 {offsets = [0, 0], sizes = [1, 128], strides = [1, 1]} : vector<8x128xf32> to vector<1x128xf32>
    %cst = arith.constant dense<0.000000e+00> : vector<128x1xf32>
    %18 = tpu.matmul %14, %17, %cst {dimension_numbers = #tpu.dot_dimension_numbers<[1], [1], [0], [0], [0, 0, 1, 0], [], []>} : vector<128x128xf32>, vector<1x128xf32>, vector<128x1xf32> -> vector<128x1xf32>
    %19 = vector.broadcast %18 : vector<128x1xf32> to vector<128x256xf32>
    %20 = arith.addf %12, %19 : vector<128x256xf32>
    %c0_10 = arith.constant 0 : index
    %c0_11 = arith.constant 0 : index
    %21 = vector.load %arg13[%c0_10, %c0_11] : memref<1x256xf32, #tpu.memory_space<vmem>>, vector<1x256xf32>
    %22 = vector.broadcast %21 : vector<1x256xf32> to vector<128x256xf32>
    %23 = arith.addf %20, %22 : vector<128x256xf32>
    %cst_12 = arith.constant 0.000000e+00 : f32
    %24 = vector.broadcast %cst_12 : f32 to vector<128x256xf32>
    %25 = arith.cmpf oge, %23, %24 : vector<128x256xf32>
    %cst_13 = arith.constant 2.000000e-01 : f32
    %26 = vector.broadcast %cst_13 : f32 to vector<128x256xf32>
    %27 = arith.mulf %26, %23 : vector<128x256xf32>
    %28 = arith.select %25, %23, %27 : vector<128x256xi1>, vector<128x256xf32>
    %cst_14 = arith.constant dense<0xFF800000> : vector<128xf32>
    %29 = vector.multi_reduction <maximumf>, %28, %cst_14 [1] : vector<128x256xf32> to vector<128xf32>
    %30 = vector.shape_cast %29 : vector<128xf32> to vector<128x1xf32>
    %31 = vector.broadcast %30 : vector<128x1xf32> to vector<128x256xf32>
    %32 = arith.subf %28, %31 : vector<128x256xf32>
    %33 = math.exp %32 : vector<128x256xf32>
    %cst_15 = arith.constant dense<0.000000e+00> : vector<128xf32>
    %34 = vector.multi_reduction <add>, %33, %cst_15 [1] : vector<128x256xf32> to vector<128xf32>
    %35 = vector.shape_cast %34 : vector<128xf32> to vector<128x1xf32>
    %36 = tpu.reciprocal %35 : vector<128x1xf32> -> vector<128x1xf32>
    %37 = vector.broadcast %36 : vector<128x1xf32> to vector<128x256xf32>
    %38 = arith.mulf %33, %37 : vector<128x256xf32>
    %c0_16 = arith.constant 0 : index
    %c0_17 = arith.constant 0 : index
    %39 = vector.load %arg11[%c0_16, %c0_17] : memref<256x128xf32, #tpu.memory_space<vmem>>, vector<256x128xf32>
    %cst_18 = arith.constant dense<0.000000e+00> : vector<128x128xf32>
    %40 = tpu.matmul %38, %39, %cst_18 {dimension_numbers = #tpu.dot_dimension_numbers<[1], [0], [0], [1], [0, 0, 1, 1], [], []>} : vector<128x256xf32>, vector<256x128xf32>, vector<128x128xf32> -> vector<128x128xf32>
    %c0_19 = arith.constant 0 : index
    %c0_20 = arith.constant 0 : index
    %c0_21 = arith.constant 0 : index
    %41 = vector.load %arg7[%c0_19, %c0_20, %c0_21] : memref<1x1x128xf32, #tpu.memory_space<vmem>>, vector<1x1x128xf32>
    %42 = vector.shape_cast %41 : vector<1x1x128xf32> to vector<1x128xf32>
    %43 = vector.broadcast %42 : vector<1x128xf32> to vector<128x128xf32>
    %44 = arith.addf %40, %43 : vector<128x128xf32>
    %cst_22 = arith.constant dense<0.000000e+00> : vector<128xf32>
    %45 = vector.multi_reduction <add>, %44, %cst_22 [1] : vector<128x128xf32> to vector<128xf32>
    %46 = vector.shape_cast %45 : vector<128xf32> to vector<128x1xf32>
    %cst_23 = arith.constant 3.125000e-02 : f32
    %47 = vector.broadcast %cst_23 : f32 to vector<128x1xf32>
    %48 = arith.mulf %46, %47 : vector<128x1xf32>
    %49 = vector.broadcast %48 : vector<128x1xf32> to vector<128x128xf32>
    %50 = arith.subf %44, %49 : vector<128x128xf32>
    %51 = arith.mulf %50, %50 : vector<128x128xf32>
    %cst_24 = arith.constant dense<0.000000e+00> : vector<128xf32>
    %52 = vector.multi_reduction <add>, %51, %cst_24 [1] : vector<128x128xf32> to vector<128xf32>
    %53 = vector.shape_cast %52 : vector<128xf32> to vector<128x1xf32>
    %cst_25 = arith.constant 9.600000e+01 : f32
    %54 = vector.broadcast %cst_25 : f32 to vector<128x1xf32>
    %55 = arith.mulf %54, %48 : vector<128x1xf32>
    %56 = arith.mulf %55, %48 : vector<128x1xf32>
    %57 = arith.subf %53, %56 : vector<128x1xf32>
    %cst_26 = arith.constant 3.125000e-02 : f32
    %58 = vector.broadcast %cst_26 : f32 to vector<128x1xf32>
    %59 = arith.mulf %57, %58 : vector<128x1xf32>
    %cst_27 = arith.constant 9.99999974E-6 : f32
    %60 = vector.broadcast %cst_27 : f32 to vector<128x1xf32>
    %61 = arith.addf %59, %60 : vector<128x1xf32>
    %62 = math.rsqrt %61 : vector<128x1xf32>
    %63 = vector.broadcast %62 : vector<128x1xf32> to vector<128x128xf32>
    %64 = arith.mulf %50, %63 : vector<128x128xf32>
    %c0_28 = arith.constant 0 : index
    %c0_29 = arith.constant 0 : index
    %c0_30 = arith.constant 0 : index
    %65 = vector.load %arg8[%c0_28, %c0_29, %c0_30] : memref<1x1x128xf32, #tpu.memory_space<vmem>>, vector<1x1x128xf32>
    %66 = vector.shape_cast %65 : vector<1x1x128xf32> to vector<1x128xf32>
    %67 = vector.broadcast %66 : vector<1x128xf32> to vector<128x128xf32>
    %68 = arith.mulf %64, %67 : vector<128x128xf32>
    %c0_31 = arith.constant 0 : index
    %c0_32 = arith.constant 0 : index
    %c0_33 = arith.constant 0 : index
    %69 = vector.load %arg9[%c0_31, %c0_32, %c0_33] : memref<1x1x128xf32, #tpu.memory_space<vmem>>, vector<1x1x128xf32>
    %70 = vector.shape_cast %69 : vector<1x1x128xf32> to vector<1x128xf32>
    %71 = vector.broadcast %70 : vector<1x128xf32> to vector<128x128xf32>
    %72 = arith.addf %68, %71 : vector<128x128xf32>
    %cst_34 = arith.constant 0.000000e+00 : f32
    %73 = vector.broadcast %cst_34 : f32 to vector<128x128xf32>
    %74 = arith.maximumf %72, %73 : vector<128x128xf32>
    %75 = arith.index_cast %9 : i32 to index
    %c0_35 = arith.constant 0 : index
    %76 = vector.load %arg12[%75, %c0_35] : memref<256x128xf32, #tpu.memory_space<vmem>>, vector<128x128xf32>
    tpu.vector_store %arg12[%75, %c0_35], %74 {strides = array<i32>} : memref<256x128xf32, #tpu.memory_space<vmem>>, vector<128x128xf32>,
    %c2_i32 = arith.constant 2 : i32
    %77 = arith.cmpi eq, %arg0, %c2_i32 : i32
    %78 = arith.extui %77 : i1 to i32
    %c0_i32_36 = arith.constant 0 : i32
    %79 = arith.cmpi ne, %78, %c0_i32_36 : i32
    scf.if %79 {
      %c0_37 = arith.constant 0 : index
      %c0_38 = arith.constant 0 : index
      %80 = vector.load %arg10[%c0_37, %c0_38] : memref<8x128xf32, #tpu.memory_space<vmem>>, vector<8x128xf32>
      %c0_39 = arith.constant 0 : index
      %c0_40 = arith.constant 0 : index
      %81 = vector.load %arg4[%c0_39, %c0_40] : memref<8x128xf32, #tpu.memory_space<vmem>>, vector<8x128xf32>
      %cst_41 = arith.constant dense<0.000000e+00> : vector<8x128xf32>
      %82 = tpu.matmul %81, %74, %cst_41 {dimension_numbers = #tpu.dot_dimension_numbers<[1], [0], [0], [1], [0, 0, 1, 1], [], []>} : vector<8x128xf32>, vector<128x128xf32>, vector<8x128xf32> -> vector<8x128xf32>
      %83 = arith.addf %80, %82 : vector<8x128xf32>
      %c0_42 = arith.constant 0 : index
      %c0_43 = arith.constant 0 : index
      %84 = vector.load %arg10[%c0_42, %c0_43] : memref<8x128xf32, #tpu.memory_space<vmem>>, vector<8x128xf32>
      tpu.vector_store %arg10[%c0_42, %c0_43], %83 {strides = array<i32>} : memref<8x128xf32, #tpu.memory_space<vmem>>, vector<8x128xf32>,
    } else {
    }
    return
  }
  func.func @transform_1(%arg0: i32, %arg1: i32) -> (i32, i32, i32) {
    %c0_i32 = arith.constant 0 : i32
    %c0_i32_0 = arith.constant 0 : i32
    return %arg0, %arg1, %c0_i32 : i32, i32, i32
  }
  func.func @transform_2(%arg0: i32, %arg1: i32) -> (i32, i32) {
    %c0_i32 = arith.constant 0 : i32
    %c0_i32_0 = arith.constant 0 : i32
    return %c0_i32, %arg1 : i32, i32
  }
  func.func @transform_3(%arg0: i32, %arg1: i32) -> (i32, i32, i32) {
    %c0_i32 = arith.constant 0 : i32
    %c0_i32_0 = arith.constant 0 : i32
    %c0_i32_1 = arith.constant 0 : i32
    return %arg0, %c0_i32, %c0_i32_0 : i32, i32, i32
  }
  func.func @transform_4(%arg0: i32, %arg1: i32) -> (i32, i32, i32) {
    %c0_i32 = arith.constant 0 : i32
    %c0_i32_0 = arith.constant 0 : i32
    %c0_i32_1 = arith.constant 0 : i32
    return %arg0, %c0_i32, %c0_i32_0 : i32, i32, i32
  }
  func.func @transform_5(%arg0: i32, %arg1: i32) -> (i32, i32, i32) {
    %c0_i32 = arith.constant 0 : i32
    %c0_i32_0 = arith.constant 0 : i32
    %c0_i32_1 = arith.constant 0 : i32
    return %arg0, %c0_i32, %c0_i32_0 : i32, i32, i32
  }
  func.func @transform_6(%arg0: i32, %arg1: i32) -> (i32, i32, i32) {
    %c0_i32 = arith.constant 0 : i32
    %c0_i32_0 = arith.constant 0 : i32
    %c0_i32_1 = arith.constant 0 : i32
    return %arg0, %c0_i32, %c0_i32_0 : i32, i32, i32
  }
  func.func @transform_7(%arg0: i32, %arg1: i32) -> (i32, i32, i32) {
    %c0_i32 = arith.constant 0 : i32
    %c0_i32_0 = arith.constant 0 : i32
    %c0_i32_1 = arith.constant 0 : i32
    return %arg0, %c0_i32, %c0_i32_0 : i32, i32, i32
  }
  func.func @transform_8(%arg0: i32, %arg1: i32) -> (i32, i32) {
    %c0_i32 = arith.constant 0 : i32
    %c0_i32_0 = arith.constant 0 : i32
    %c0_i32_1 = arith.constant 0 : i32
    return %c0_i32, %c0_i32_0 : i32, i32
  }
}

</mosaic_0001>

<bundles_post_ra>
// kernel: gnn_forward.1
= control target key start
LH: loop header
LB: loop body
LE: loop exit
PB: predicated region body
PF: predicated region fallthrough
CT: control target
= control target key end

     0   :  { %s2847_s27 = smov 0   ;;  %s2849_s28 = smov 0   ;;  %s3985_s0 = inlined_call_operand.vmem [shape: f32[256,128], index: 0, kind: input, shape index: {}]   ;;  %s3986_s1 = inlined_call_operand.vmem [shape: bf16[3,256,256], index: 1, kind: input, shape index: {}]   ;;  %s3987_s2 = inlined_call_operand.vmem [shape: f32[8,256], index: 2, kind: input, shape index: {}]   ;;  %s3988_s3 = inlined_call_operand.vmem [shape: f32[3,128,128], index: 3, kind: input, shape index: {}]   ;;  %s3989_s4 = inlined_call_operand.vmem [shape: f32[3,8,128], index: 4, kind: input, shape index: {}]   ;;  %s3990_s5 = inlined_call_operand.vmem [shape: f32[3,1,128], index: 5, kind: input, shape index: {}]   ;;  %s3991_s6 = inlined_call_operand.vmem [shape: f32[3,1,128], index: 6, kind: input, shape index: {}]   ;;  %s3992_s7 = inlined_call_operand.vmem [shape: f32[3,1,128], index: 7, kind: input, shape index: {}]   ;;  %s3993_s8 = inlined_call_operand.vmem [shape: f32[8,128], index: 8, kind: output, shape index: {}]  }
   0x1   :  { %3996 = sst [smem:[#allocation12_spill]] %s3988_s3  ;;  %s2851_s29 = smov 0  }
   0x2   :  { %s2853_s30 = smov 0   ;;  %s2855_s9 = smov 0  }
   0x3 LB: > { %3997 = sst [smem:[#allocation8_spill]] %s2787_s29  ;;  %s27_s10 = sadd.s32 1, %s2787_s29  ;;  %s2795_s9 = sphi %s2855_s9, %s18_s9   ;;  %s2791_s30 = sphi %s2853_s30, %s4005_s30   ;;  %s2787_s29 = sphi %s2851_s29, %s4004_s29   ;;  %s2783_s28 = sphi %s2849_s28, %s4003_s28   ;;  %s2779_s27 = sphi %s2847_s27, %s4002_s27  }
   0x4   : > { %3998 = sst [smem:[#allocation9_spill]] %s2791_s30  ;;  %s30_s11 = sadd.s32 1, %s2791_s30 }
   0x5   : > { %p28_p0 = scmp.ge.s32.totalorder %s27_s10, 2  ;;  %p2134_p1 = scmp.ge.s32.totalorder %s2795_s9, 1 }
   0x6   : > { %p305_p2 = scmp.lt.s32.totalorder %s2795_s9, 7 }
   0x7   : > { %s4007_s10 = smov (%p28_p0, %s27_s10), 0  ;;  %s4009_s11 = smov (!%p28_p0, %s30_s11), %s2791_s30 }
   0x8   : > { %3999 = sst [smem:[#allocation10_spill]] %s4007_s10  ;;  %p306_p3 = pnand %p2134_p1, %p305_p2 }
   0x9   : > { %p32_p4 = scmp.ge.s32.totalorder %s4009_s11, 3  ;;  %s2135_s12 = sshll.u32 (!%p306_p3), %s2779_s27, 4 }
   0xa   : > { %309 = sbr.rel (%p306_p3) target bundleno = 1914 (0x77a), region = 48  ;;  %p360_p5 = scmp.lt.s32.totalorder (!%p306_p3), %s2783_s28, 2 }
   0xb   : > { %s4011_s11 = smov (%p32_p4, %s4009_s11), 0  ;;  %p362_p6 = scmp.lt.s32.totalorder (!%p306_p3), %s2135_s12, 31 }
   0xc   : > { %4000 = sst [smem:[#allocation11_spill]] %s4011_s11  ;;  %p370_p7 = scmp.lt.s32.totalorder (!%p306_p3), %s2779_s27, 1 }
   0xd   : > { %s4001_s3 = sld [smem:[#allocation12_spill]] (!%p306_p3)  ;;  %p392_p8 = scmp.eq.s32.totalorder (!%p306_p3), %s2783_s28, 0 }
   0xe   : > { %p393_p9 = scmp.eq.s32.totalorder (!%p306_p3), %s2779_s27, 0 }
  0x10   : > { %p394_p10 = pnand (!%p306_p3), %p393_p9, %p392_p8 }
  0x11   : > { %s2885_s13 = scalar_select %p360_p5, %s2783_s28, 2 }
  0x12   : > { %s4013_s12 = smov (!%p362_p6, %s2135_s12), 31 }
  0x13   : > { %s2137_s14 = sshll.u32 %s2885_s13, 6  ;;  %s2151_s15 = sshll.u32 %s2885_s13, 7 }
  0x14   : > { %s2136_s16 = sshll.u32 %s4013_s12, 1  ;;  %s2892_s19 = scalar_lea.vmem %s4001_s3, %s2151_s15 }
  0x15   : > { %s366_s20 = sadd.s32 %s2137_s14, %s2136_s16  ;;  %s2142_s21 = sshll.u32 %s2885_s13, 3 }
  0x16   : > { %s2138_s22 = sshll.u32 %s366_s20, 2  ;;  %s2898_s25 = scalar_lea.vmem %s3989_s4, %s2142_s21 }
  0x17   : > { %s2903_s10 = scalar_lea.vmem %s3986_s1, %s2138_s22  ;;  %s385_s29 = scalar_lea.vmem %s3990_s5, %s2885_s13 }
  0x18   : > { %s371_s17 = scalar_select %p370_p7, %s2779_s27, 1 }
  0x19   : > { %s388_s14 = scalar_lea.vmem %s3991_s6, %s2885_s13  ;;  %s391_s23 = scalar_lea.vmem %s3992_s7, %s2885_s13 }
  0x1a   : > { %s2139_s21 = sshll.u32 %s371_s17, 3  ;;  %397 = sbr.rel (%p394_p10) target bundleno = 54 (0x36), region = 52 }
  0x1b   : > { %s2922_s11 = scalar_lea.vmem %s3987_s2, %s2139_s21 }
  0x21   : > { %v430_v0 = vld [vmem:[%s3985_s0] sm:$0xff]  ;;  %v432_v1 = vld [vmem:[%s3985_s0 + $0x8] sm:$0xff]  ;;  %v434_v2 = vld [vmem:[%s3985_s0 + $0x10] sm:$0xff] }
  0x22   : > { %431 = vst [vmem:[#allocation3] sm:$0xff] %v430_v0  ;;  %433 = vst [vmem:[#allocation3 + $0x8] sm:$0xff] %v432_v1  ;;  %v436_v3 = vld [vmem:[%s3985_s0 + $0x18] sm:$0xff]  ;;  %v438_v4 = vld [vmem:[%s3985_s0 + $0x20] sm:$0xff] }
  0x23   : > { %435 = vst [vmem:[#allocation3 + $0x10] sm:$0xff] %v434_v2  ;;  %v440_v5 = vld [vmem:[%s3985_s0 + $0x28] sm:$0xff]  ;;  %437 = vst [vmem:[#allocation3 + $0x18] sm:$0xff] %v436_v3  ;;  %v442_v6 = vld [vmem:[%s3985_s0 + $0x30] sm:$0xff] }
  0x24   : > { %439 = vst [vmem:[#allocation3 + $0x20] sm:$0xff] %v438_v4  ;;  %441 = vst [vmem:[#allocation3 + $0x28] sm:$0xff] %v440_v5  ;;  %v444_v7 = vld [vmem:[%s3985_s0 + $0x38] sm:$0xff]  ;;  %v446_v8 = vld [vmem:[%s3985_s0 + $0x40] sm:$0xff] }
  0x25   : > { %443 = vst [vmem:[#allocation3 + $0x30] sm:$0xff] %v442_v6  ;;  %445 = vst [vmem:[#allocation3 + $0x38] sm:$0xff] %v444_v7  ;;  %v448_v9 = vld [vmem:[%s3985_s0 + $0x48] sm:$0xff]  ;;  %v450_v10 = vld [vmem:[%s3985_s0 + $0x50] sm:$0xff] }
  0x26   : > { %447 = vst [vmem:[#allocation3 + $0x40] sm:$0xff] %v446_v8  ;;  %v452_v11 = vld [vmem:[%s3985_s0 + $0x58] sm:$0xff]  ;;  %449 = vst [vmem:[#allocation3 + $0x48] sm:$0xff] %v448_v9  ;;  %v454_v12 = vld [vmem:[%s3985_s0 + $0x60] sm:$0xff] }
  0x27   : > { %451 = vst [vmem:[#allocation3 + $0x50] sm:$0xff] %v450_v10  ;;  %453 = vst [vmem:[#allocation3 + $0x58] sm:$0xff] %v452_v11  ;;  %v456_v13 = vld [vmem:[%s3985_s0 + $0x68] sm:$0xff]  ;;  %v458_v14 = vld [vmem:[%s3985_s0 + $0x70] sm:$0xff] }
  0x28   : > { %455 = vst [vmem:[#allocation3 + $0x60] sm:$0xff] %v454_v12  ;;  %457 = vst [vmem:[#allocation3 + $0x68] sm:$0xff] %v456_v13  ;;  %v460_v15 = vld [vmem:[%s3985_s0 + $0x78] sm:$0xff]  ;;  %v462_v16 = vld [vmem:[%s3985_s0 + $0x80] sm:$0xff] }
  0x29   : > { %459 = vst [vmem:[#allocation3 + $0x70] sm:$0xff] %v458_v14  ;;  %v464_v17 = vld [vmem:[%s3985_s0 + $0x88] sm:$0xff]  ;;  %461 = vst [vmem:[#allocation3 + $0x78] sm:$0xff] %v460_v15  ;;  %v466_v18 = vld [vmem:[%s3985_s0 + $0x90] sm:$0xff] }
  0x2a   : > { %463 = vst [vmem:[#allocation3 + $0x80] sm:$0xff] %v462_v16  ;;  %465 = vst [vmem:[#allocation3 + $0x88] sm:$0xff] %v464_v17  ;;  %v468_v19 = vld [vmem:[%s3985_s0 + $0x98] sm:$0xff]  ;;  %v470_v20 = vld [vmem:[%s3985_s0 + $0xa0] sm:$0xff] }
  0x2b   : > { %467 = vst [vmem:[#allocation3 + $0x90] sm:$0xff] %v466_v18  ;;  %469 = vst [vmem:[#allocation3 + $0x98] sm:$0xff] %v468_v19  ;;  %v472_v21 = vld [vmem:[%s3985_s0 + $0xa8] sm:$0xff]  ;;  %v474_v22 = vld [vmem:[%s3985_s0 + $0xb0] sm:$0xff] }
  0x2c   : > { %471 = vst [vmem:[#allocation3 + $0xa0] sm:$0xff] %v470_v20  ;;  %v476_v23 = vld [vmem:[%s3985_s0 + $0xb8] sm:$0xff]  ;;  %473 = vst [vmem:[#allocation3 + $0xa8] sm:$0xff] %v472_v21  ;;  %v478_v24 = vld [vmem:[%s3985_s0 + $0xc0] sm:$0xff] }
  0x2d   : > { %475 = vst [vmem:[#allocation3 + $0xb0] sm:$0xff] %v474_v22  ;;  %477 = vst [vmem:[#allocation3 + $0xb8] sm:$0xff] %v476_v23  ;;  %v480_v25 = vld [vmem:[%s3985_s0 + $0xc8] sm:$0xff]  ;;  %v482_v26 = vld [vmem:[%s3985_s0 + $0xd0] sm:$0xff] }
  0x2e   : > { %479 = vst [vmem:[#allocation3 + $0xc0] sm:$0xff] %v478_v24  ;;  %481 = vst [vmem:[#allocation3 + $0xc8] sm:$0xff] %v480_v25  ;;  %v484_v27 = vld [vmem:[%s3985_s0 + $0xd8] sm:$0xff]  ;;  %v486_v28 = vld [vmem:[%s3985_s0 + $0xe0] sm:$0xff] }
  0x2f   : > { %483 = vst [vmem:[#allocation3 + $0xd0] sm:$0xff] %v482_v26  ;;  %v488_v29 = vld [vmem:[%s3985_s0 + $0xe8] sm:$0xff]  ;;  %485 = vst [vmem:[#allocation3 + $0xd8] sm:$0xff] %v484_v27  ;;  %v490_v30 = vld [vmem:[%s3985_s0 + $0xf0] sm:$0xff] }
  0x30   : > { %487 = vst [vmem:[#allocation3 + $0xe0] sm:$0xff] %v486_v28  ;;  %489 = vst [vmem:[#allocation3 + $0xe8] sm:$0xff] %v488_v29  ;;  %v492_v31 = vld [vmem:[%s3985_s0 + $0xf8] sm:$0xff] }
  0x31   : > { %491 = vst [vmem:[#allocation3 + $0xf0] sm:$0xff] %v490_v30  ;;  %493 = vst [vmem:[#allocation3 + $0xf8] sm:$0xff] %v492_v31 }
  0x32   : > { %501 = vsyncadd [#allocation5], 4096 }
  0x33   : > { %2775 = dma.done.wait [#allocation5], 4096 }
  0x34   : > { %2776 = vsyncadd [#allocation5], 4294963200  ;;  %v2797_v32 = vmov 0.0  }
  0x35   : > { %505 = vst [vmem:[%s3993_s8] sm:$0xff] %v2797_v32 }
  0x36 PF: > { %p2143_p11 = scmp.ne.s32.totalorder %s2779_s27, 0 }
  0x37   : > { %v541_v33 = vld [vmem:[%s2892_s19] sm:$0xff] (!%p2143_p11)  ;;  %v542_v34 = vld [vmem:[%s2892_s19 + $0x8] sm:$0xff] (!%p2143_p11)  ;;  %v543_v35 = vld [vmem:[%s2892_s19 + $0x10] sm:$0xff] (!%p2143_p11) }
  0x38   : > { %508 = sbr.rel (%p2143_p11) target bundleno = 621 (0x26d), region = 91  ;;  %v2446_v36 = vpack.c.bf16 (!%p2143_p11), %v542_v34, %v541_v33  ;;  %v544_v37 = vld [vmem:[%s2892_s19 + $0x18] sm:$0xff] (!%p2143_p11)  ;;  %v545_v39 = vld [vmem:[%s2892_s19 + $0x20] sm:$0xff] (!%p2143_p11)  ;;  %v546_v40 = vld [vmem:[%s2892_s19 + $0x28] sm:$0xff] (!%p2143_p11) }
  0x39   : > { %v2450_v38 = vpack.c.bf16 (!%p2143_p11), %v544_v37, %v543_v35  ;;  %v2454_v41 = vpack.c.bf16 (!%p2143_p11), %v546_v40, %v545_v39  ;;  %v509_v42 = vld [vmem:[#allocation3] sm:$0xff] (!%p2143_p11)  ;;  %v547_v43 = vld [vmem:[%s2892_s19 + $0x30] sm:$0xff] (!%p2143_p11)  ;;  %v548_v44 = vld [vmem:[%s2892_s19 + $0x38] sm:$0xff] (!%p2143_p11) }
  0x3a   : > { %2447 = vmatprep.subr.bf16.mxu0 (!%p2143_p11), %v2446_v36  ;;  %2363 = vmatprep.mubr.f32.mxu0 (!%p2143_p11), %v509_v42  ;;  %v2458_v45 = vpack.c.bf16 (!%p2143_p11), %v548_v44, %v547_v43  ;;  %v549_v46 = vld [vmem:[%s2892_s19 + $0x40] sm:$0xff] (!%p2143_p11)  ;;  %v550_v47 = vld [vmem:[%s2892_s19 + $0x48] sm:$0xff] (!%p2143_p11)  ;;  %v551_v49 = vld [vmem:[%s2892_s19 + $0x50] sm:$0xff] (!%p2143_p11) }
  0x3b   : > { %2449 = vmatpush3.bf16.msra.mxu0 (!%p2143_p11), %v2446_v36  ;;  %v2462_v48 = vpack.c.bf16 (!%p2143_p11), %v550_v47, %v549_v46  ;;  %v552_v50 = vld [vmem:[%s2892_s19 + $0x58] sm:$0xff] (!%p2143_p11)  ;;  %v553_v52 = vld [vmem:[%s2892_s19 + $0x60] sm:$0xff] (!%p2143_p11)  ;;  %v554_v53 = vld [vmem:[%s2892_s19 + $0x68] sm:$0xff] (!%p2143_p11) }
  0x3c   : > { %2451 = vmatprep.subr.bf16.mxu0 (!%p2143_p11), %v2450_v38  ;;  %v2466_v51 = vpack.c.bf16 (!%p2143_p11), %v552_v50, %v551_v49  ;;  %v2470_v54 = vpack.c.bf16 (!%p2143_p11), %v554_v53, %v553_v52  ;;  %v555_v55 = vld [vmem:[%s2892_s19 + $0x70] sm:$0xff] (!%p2143_p11)  ;;  %v556_v56 = vld [vmem:[%s2892_s19 + $0x78] sm:$0xff] (!%p2143_p11)  ;;  %v510_v58 = vld [vmem:[#allocation3 + $0x8] sm:$0xff] (!%p2143_p11) }
  0x3d   : > { %v2474_v57 = vpack.c.bf16 (!%p2143_p11), %v556_v56, %v555_v55  ;;  %v511_v59 = vld [vmem:[#allocation3 + $0x10] sm:$0xff] (!%p2143_p11)  ;;  %v512_v60 = vld [vmem:[#allocation3 + $0x18] sm:$0xff] (!%p2143_p11)  ;;  %v513_v61 = vld [vmem:[#allocation3 + $0x20] sm:$0xff] (!%p2143_p11) }
  0x3e   : > { %v514_v62 = vld [vmem:[#allocation3 + $0x28] sm:$0xff] (!%p2143_p11)  ;;  %v515_v63 = vld [vmem:[#allocation3 + $0x30] sm:$0xff] (!%p2143_p11)  ;;  %v516_v0 = vld [vmem:[#allocation3 + $0x38] sm:$0xff] (!%p2143_p11) }
  0x3f   : > { %2453 = vmatpush3.bf16.msra.mxu0 %v2450_v38  ;;  %v517_v1 = vld [vmem:[#allocation3 + $0x40] sm:$0xff]  ;;  %v518_v2 = vld [vmem:[#allocation3 + $0x48] sm:$0xff]  ;;  %v519_v3 = vld [vmem:[#allocation3 + $0x50] sm:$0xff] }
  0x40   : > { %2455 = vmatprep.subr.bf16.mxu0 %v2454_v41  ;;  %v520_v4 = vld [vmem:[#allocation3 + $0x58] sm:$0xff]  ;;  %v521_v5 = vld [vmem:[#allocation3 + $0x60] sm:$0xff]  ;;  %v522_v6 = vld [vmem:[#allocation3 + $0x68] sm:$0xff] }
  0x41   : > { %v523_v7 = vld [vmem:[#allocation3 + $0x70] sm:$0xff]  ;;  %v524_v8 = vld [vmem:[#allocation3 + $0x78] sm:$0xff]  ;;  %v525_v9 = vld [vmem:[#allocation3 + $0x80] sm:$0xff] }
  0x42   : > { %v526_v10 = vld [vmem:[#allocation3 + $0x88] sm:$0xff]  ;;  %v527_v11 = vld [vmem:[#allocation3 + $0x90] sm:$0xff]  ;;  %v528_v12 = vld [vmem:[#allocation3 + $0x98] sm:$0xff] }
  0x43   : > { %2457 = vmatpush3.bf16.msra.mxu0 %v2454_v41  ;;  %v529_v13 = vld [vmem:[#allocation3 + $0xa0] sm:$0xff]  ;;  %v530_v14 = vld [vmem:[#allocation3 + $0xa8] sm:$0xff]  ;;  %v531_v15 = vld [vmem:[#allocation3 + $0xb0] sm:$0xff] }
  0x44   : > { %2459 = vmatprep.subr.bf16.mxu0 %v2458_v45  ;;  %v532_v16 = vld [vmem:[#allocation3 + $0xb8] sm:$0xff]  ;;  %v533_v17 = vld [vmem:[#allocation3 + $0xc0] sm:$0xff]  ;;  %v534_v18 = vld [vmem:[#allocation3 + $0xc8] sm:$0xff] }
  0x45   : > { %v535_v19 = vld [vmem:[#allocation3 + $0xd0] sm:$0xff]  ;;  %v536_v20 = vld [vmem:[#allocation3 + $0xd8] sm:$0xff]  ;;  %v537_v21 = vld [vmem:[#allocation3 + $0xe0] sm:$0xff] }
  0x46   : > { %v538_v22 = vld [vmem:[#allocation3 + $0xe8] sm:$0xff]  ;;  %v539_v23 = vld [vmem:[#allocation3 + $0xf0] sm:$0xff]  ;;  %v540_v24 = vld [vmem:[#allocation3 + $0xf8] sm:$0xff] }
  0x47   : > { %2461 = vmatpush3.bf16.msra.mxu0 %v2458_v45  ;;  %v3042_v25 = vld [vmem:[%s2898_s25] sm:$0xff] }
  0x48   : > { %2463 = vmatprep.subr.bf16.mxu0 %v2462_v48  ;;  %v816_v26 = vrot.slane %v3042_v25, 1 }
  0x4a   : > { %2232 = vmatprep.mubr.f32.mxu1 %v816_v26 }
  0x4b   : > { %2465 = vmatpush3.bf16.msra.mxu0 %v2462_v48 }
  0x4c   : > { %2467 = vmatprep.subr.bf16.mxu0 %v2466_v51 }
  0x4f   : > { %2469 = vmatpush3.bf16.msra.mxu0 %v2466_v51 }
  0x50   : > { %2471 = vmatprep.subr.bf16.mxu0 %v2470_v54 }
  0x53   : > { %2473 = vmatpush3.bf16.msra.mxu0 %v2470_v54 }
  0x54   : > { %2475 = vmatprep.subr.bf16.mxu0 %v2474_v57 }
  0x57   : > { %2477 = vmatpush3.bf16.msra.mxu0 %v2474_v57 }
  0x5a   : > { %2364 = vmatmul.mubr.f32.vlgmr.msra.gmra.mrb[0].mxu0 %v510_v58 }
  0x5b   : > { %2366 = vmatprep.mubr.f32.mxu0 %v511_v59 }
  0x5e   : > { %2367 = vmatmul.mubr.f32.gmra.mrb[2].mxu0 %v512_v60 }
  0x5f   : > { %2369 = vmatprep.mubr.f32.mxu0 %v513_v61 }
  0x62   : > { %2370 = vmatmul.mubr.f32.gmra.mrb[4].mxu0 %v514_v62 }
  0x63   : > { %2372 = vmatprep.mubr.f32.mxu0 %v515_v63 }
  0x66   : > { %2373 = vmatmul.mubr.f32.gmra.mrb[6].mxu0 %v516_v0 }
  0x67   : > { %2375 = vmatprep.mubr.f32.mxu0 %v517_v1 }
  0x6a   : > { %2376 = vmatmul.mubr.f32.gmra.mrb[8].mxu0 %v518_v2 }
  0x6b   : > { %2378 = vmatprep.mubr.f32.mxu0 %v519_v3 }
  0x6e   : > { %2379 = vmatmul.mubr.f32.gmra.mrb[10].mxu0 %v520_v4 }
  0x6f   : > { %2381 = vmatprep.mubr.f32.mxu0 %v521_v5 }
  0x72   : > { %2382 = vmatmul.mubr.f32.gmra.mrb[12].mxu0 %v522_v6 }
  0x73   : > { %2384 = vmatprep.mubr.f32.mxu0 %v523_v7 }
  0x76   : > { %2385 = vmatmul.mubr.f32.gmra.mrb[14].mxu0 %v524_v8 }
  0x77   : > { %2387 = vmatprep.mubr.f32.mxu0 %v525_v9 }
  0x7a   : > { %2388 = vmatmul.mubr.f32.gmra.mrb[16].mxu0 %v526_v10 }
  0x7b   : > { %2390 = vmatprep.mubr.f32.mxu0 %v527_v11  ;;  %v2798_v11 = vmov 1966171168  }
  0x7e   : > { %2391 = vmatmul.mubr.f32.gmra.mrb[18].mxu0 %v528_v12  ;;  %v893_v12 = vunpack.c.l.s4 %v2798_v11 }
  0x7f   : > { %2393 = vmatprep.mubr.f32.mxu0 %v529_v13  ;;  %v895_v13 = vlaneseq }
  0x81   : > { %vm909_vm0 = vcmp.lt.s32.totalorder %v895_v13, 256 }
  0x82   : > { %2394 = vmatmul.mubr.f32.gmra.mrb[20].mxu0 %v530_v14  ;;  %v894_v14 = vunpack.c.0.s8 %v893_v12 }
  0x83   : > { %2396 = vmatprep.mubr.f32.mxu0 %v531_v15  ;;  %v896_v15 = vshrl.u32 %v895_v13, 7 }
  0x86   : > { %2397 = vmatmul.mubr.f32.gmra.mrb[22].mxu0 %v532_v16 }
  0x87   : > { %2399 = vmatprep.mubr.f32.mxu0 %v533_v17  ;;  %v897_v17 = vsub.s32 %v894_v14, %v896_v15 }
  0x8a   : > { %2400 = vmatmul.mubr.f32.gmra.mrb[24].mxu0 %v534_v18 }
  0x8b   : > { %2402 = vmatprep.mubr.f32.mxu0 %v535_v19 }
  0x8e   : > { %2403 = vmatmul.mubr.f32.gmra.mrb[26].mxu0 %v536_v20 }
  0x8f   : > { %2405 = vmatprep.mubr.f32.mxu0 %v537_v21 }
  0x92   : > { %2406 = vmatmul.mubr.f32.gmra.mrb[28].mxu0 %v538_v22 }
  0x93   : > { %2408 = vmatprep.mubr.f32.mxu0 %v539_v23 }
  0x96   : > { %2409 = vmatmul.mubr.f32.gmra.mrb[30].mxu0 %v540_v24 }
 0x12d   : > { %v2365_v27 = vpop.f32.mrb[0].mxu0 }
 0x12e   : > { %783 = vst [vmem:[#allocation2 + $0x8] sm:$0xff] %v2365_v27  ;;  %v623_v28 = vpop.f32.mrb[1].mxu0 }
 0x12f   : > { %782 = vst [vmem:[#allocation2] sm:$0xff] %v623_v28  ;;  %v2480_v29 = vpack.c.bf16 %v2365_v27, %v623_v28 }
 0x131   : > { %v2368_v30 = vpop.f32.mrb[2].mxu0 }
 0x132   : > { %785 = vst [vmem:[#allocation2 + $0x18] sm:$0xff] %v2368_v30  ;;  %v633_v31 = vpop.f32.mrb[3].mxu0 }
 0x133   : > { %784 = vst [vmem:[#allocation2 + $0x10] sm:$0xff] %v633_v31  ;;  %v2484_v32 = vpack.c.bf16 %v2368_v30, %v633_v31 }
 0x135   : > { %v2371_v33 = vpop.f32.mrb[4].mxu0 }
 0x136   : > { %787 = vst [vmem:[#allocation2 + $0x28] sm:$0xff] %v2371_v33  ;;  %v643_v34 = vpop.f32.mrb[5].mxu0 }
 0x137   : > { %786 = vst [vmem:[#allocation2 + $0x20] sm:$0xff] %v643_v34  ;;  %v2488_v35 = vpack.c.bf16 %v2371_v33, %v643_v34 }
 0x139   : > { %v3047_v36 = vpop.f32.mrb[6].mxu0 }
 0x13a   : > { %789 = vst [vmem:[#allocation2 + $0x38] sm:$0xff] %v3047_v36  ;;  %v3050_v37 = vpop.f32.mrb[7].mxu0 }
 0x13b   : > { %788 = vst [vmem:[#allocation2 + $0x30] sm:$0xff] %v3050_v37  ;;  %v2492_v38 = vpack.c.bf16 %v3047_v36, %v3050_v37 }
 0x13d   : > { %v3055_v39 = vpop.f32.mrb[8].mxu0 }
 0x13e   : > { %791 = vst [vmem:[#allocation2 + $0x48] sm:$0xff] %v3055_v39  ;;  %v3058_v40 = vpop.f32.mrb[9].mxu0 }
 0x13f   : > { %790 = vst [vmem:[#allocation2 + $0x40] sm:$0xff] %v3058_v40  ;;  %v2496_v41 = vpack.c.bf16 %v3055_v39, %v3058_v40 }
 0x141   : > { %v3063_v42 = vpop.f32.mrb[10].mxu0 }
 0x142   : > { %793 = vst [vmem:[#allocation2 + $0x58] sm:$0xff] %v3063_v42  ;;  %v3066_v43 = vpop.f32.mrb[11].mxu0 }
 0x143   : > { %792 = vst [vmem:[#allocation2 + $0x50] sm:$0xff] %v3066_v43  ;;  %v2500_v44 = vpack.c.bf16 %v3063_v42, %v3066_v43 }
 0x145   : > { %v3071_v45 = vpop.f32.mrb[12].mxu0 }
 0x146   : > { %795 = vst [vmem:[#allocation2 + $0x68] sm:$0xff] %v3071_v45  ;;  %v683_v46 = vpop.f32.mrb[13].mxu0 }
 0x147   : > { %794 = vst [vmem:[#allocation2 + $0x60] sm:$0xff] %v683_v46  ;;  %v2504_v47 = vpack.c.bf16 %v3071_v45, %v683_v46 }
 0x149   : > { %v2386_v48 = vpop.f32.mrb[14].mxu0 }
 0x14a   : > { %797 = vst [vmem:[#allocation2 + $0x78] sm:$0xff] %v2386_v48  ;;  %v693_v49 = vpop.f32.mrb[15].mxu0 }
 0x14b   : > { %796 = vst [vmem:[#allocation2 + $0x70] sm:$0xff] %v693_v49  ;;  %v2508_v50 = vpack.c.bf16 %v2386_v48, %v693_v49 }
 0x14d   : > { %v2389_v51 = vpop.f32.mrb[16].mxu0 }
 0x14e   : > { %799 = vst [vmem:[#allocation2 + $0x88] sm:$0xff] %v2389_v51  ;;  %v703_v52 = vpop.f32.mrb[17].mxu0 }
 0x14f   : > { %798 = vst [vmem:[#allocation2 + $0x80] sm:$0xff] %v703_v52  ;;  %v2478_v53 = vpack.c.bf16 %v2389_v51, %v703_v52 }
 0x151   : > { %2479 = vmatprep.subr.bf16.mxu1 %v2478_v53  ;;  %v2392_v54 = vpop.f32.mrb[18].mxu0 }
 0x152   : > { %2481 = vmatpush3.bf16.xpose.msra.mxu1 %v2480_v29  ;;  %801 = vst [vmem:[#allocation2 + $0x98] sm:$0xff] %v2392_v54  ;;  %v713_v55 = vpop.f32.mrb[19].mxu0 }
 0x153   : > { %800 = vst [vmem:[#allocation2 + $0x90] sm:$0xff] %v713_v55  ;;  %v2482_v56 = vpack.c.bf16 %v2392_v54, %v713_v55 }
 0x155   : > { %2483 = vmatprep.subr.bf16.mxu1 %v2482_v56  ;;  %v2395_v57 = vpop.f32.mrb[20].mxu0 }
 0x156   : > { %803 = vst [vmem:[#allocation2 + $0xa8] sm:$0xff] %v2395_v57  ;;  %v723_v58 = vpop.f32.mrb[21].mxu0 }
 0x157   : > { %802 = vst [vmem:[#allocation2 + $0xa0] sm:$0xff] %v723_v58  ;;  %v2486_v59 = vpack.c.bf16 %v2395_v57, %v723_v58 }
 0x159   : > { %v2398_v60 = vpop.f32.mrb[22].mxu0 }
 0x15a   : > { %2485 = vmatpush3.bf16.xpose.msra.mxu1 %v2484_v32  ;;  %805 = vst [vmem:[#allocation2 + $0xb8] sm:$0xff] %v2398_v60  ;;  %v733_v61 = vpop.f32.mrb[23].mxu0 }
 0x15b   : > { %2487 = vmatprep.subr.bf16.mxu1 %v2486_v59  ;;  %804 = vst [vmem:[#allocation2 + $0xb0] sm:$0xff] %v733_v61  ;;  %v2490_v62 = vpack.c.bf16 %v2398_v60, %v733_v61 }
 0x15d   : > { %v2401_v63 = vpop.f32.mrb[24].mxu0 }
 0x15e   : > { %807 = vst [vmem:[#allocation2 + $0xc8] sm:$0xff] %v2401_v63  ;;  %v743_v0 = vpop.f32.mrb[25].mxu0 }
 0x15f   : > { %806 = vst [vmem:[#allocation2 + $0xc0] sm:$0xff] %v743_v0  ;;  %v2494_v1 = vpack.c.bf16 %v2401_v63, %v743_v0 }
 0x161   : > { %v2404_v2 = vpop.f32.mrb[26].mxu0 }
 0x162   : > { %2489 = vmatpush3.bf16.xpose.msra.mxu1 %v2488_v35  ;;  %809 = vst [vmem:[#allocation2 + $0xd8] sm:$0xff] %v2404_v2  ;;  %v753_v3 = vpop.f32.mrb[27].mxu0 }
 0x163   : > { %2491 = vmatprep.subr.bf16.mxu1 %v2490_v62  ;;  %808 = vst [vmem:[#allocation2 + $0xd0] sm:$0xff] %v753_v3  ;;  %v2498_v4 = vpack.c.bf16 %v2404_v2, %v753_v3 }
 0x165   : > { %v2407_v5 = vpop.f32.mrb[28].mxu0 }
 0x166   : > { %811 = vst [vmem:[#allocation2 + $0xe8] sm:$0xff] %v2407_v5  ;;  %v763_v6 = vpop.f32.mrb[29].mxu0 }
 0x167   : > { %810 = vst [vmem:[#allocation2 + $0xe0] sm:$0xff] %v763_v6  ;;  %v2502_v7 = vpack.c.bf16 %v2407_v5, %v763_v6 }
 0x169   : > { %v2410_v8 = vpop.f32.mrb[30].mxu0 }
 0x16a   : > { %2493 = vmatpush3.bf16.xpose.msra.mxu1 %v2492_v38  ;;  %813 = vst [vmem:[#allocation2 + $0xf8] sm:$0xff] %v2410_v8  ;;  %v773_v9 = vpop.f32.mrb[31].mxu0 }
 0x16b   : > { %2495 = vmatprep.subr.bf16.mxu1 %v2494_v1  ;;  %812 = vst [vmem:[#allocation2 + $0xf0] sm:$0xff] %v773_v9  ;;  %v2506_v10 = vpack.c.bf16 %v2410_v8, %v773_v9 }
 0x172   : > { %2497 = vmatpush3.bf16.xpose.msra.mxu1 %v2496_v41 }
 0x173   : > { %2499 = vmatprep.subr.bf16.mxu1 %v2498_v4 }
 0x17a   : > { %2501 = vmatpush3.bf16.xpose.msra.mxu1 %v2500_v44 }
 0x17b   : > { %2503 = vmatprep.subr.bf16.mxu1 %v2502_v7 }
 0x182   : > { %2505 = vmatpush3.bf16.xpose.msra.mxu1 %v2504_v47 }
 0x183   : > { %2507 = vmatprep.subr.bf16.mxu1 %v2506_v10 }
 0x18a   : > { %2509 = vmatpush3.bf16.xpose.msra.mxu1 %v2508_v50 }
 0x191   : > { %2233 = vmatmul.mubr.f32.vlgmr.msra.gmra.mrb[0].mxu1 %v816_v26 }
 0x264   : > { %v884_v16 = vpop.f32.mrb[0].mxu1 }
 0x265   : > { %v886_v18 = vpop.f32.mrb[1].mxu1 }
 0x266   : > { %v891_v19 = vcombine.low %v884_v16, %v886_v18 }
 0x268   : > { %v898_v20 = vrot.slane %v891_v19, %v897_v17 }
 0x26a   : > { %v905_v21 = vrot.slane %v898_v20, %v897_v17 }
 0x26c   : > { %911 = vst.msk [vmem:[#allocation4] sm:$0x3] %vm909_vm0, %v905_v21 }
 0x26d PF: > { %s2144_s19 = sshll.u32 %s2779_s27, 7  ;;  %v979_v22 = vlaneseq  ;;  %v978_v24 = vld [vmem:[%s2898_s25] sm:$0xff]  ;;  %v914_v62 = vld [vmem:[%s2903_s10 + $0x8] sm:$0xff]  ;;  %v3116_v3 = vld [vmem:[%s2903_s10 + $0x10] sm:$0xff]  ;;  %p2148_p12 = scmp.ne.s32.totalorder %s2783_s28, 2 }
 0x26e   : > { %s3090_s3 = scalar_lea.vmem [#allocation2], %s2144_s19  ;;  %v913_v59 = vld [vmem:[%s2903_s10] sm:$0xff]  ;;  %v3113_v0 = vld [vmem:[%s2903_s10 + $0x48] sm:$0xff]  ;;  %v3119_v4 = vld [vmem:[%s2903_s10 + $0x50] sm:$0xff]  ;;  %v931_v7 = vunpack.c.l.bf16 %v914_v62  ;;  %v932_v8 = vunpack.c.h.bf16 %v914_v62  ;;  %v933_v17 = vunpack.c.l.bf16 %v3116_v3  ;;  %v934_v18 = vunpack.c.h.bf16 %v3116_v3  ;;  %s3836_s13 = scalar_lea.vmem [#allocation3], %s2144_s19 }
 0x26f   : > { %v3084_v23 = vshrl.u32 %v979_v22, 7  ;;  %v962_v26 = vld [vmem:[%s3090_s3] sm:$0xff]  ;;  %v963_v27 = vld [vmem:[%s3090_s3 + $0x8] sm:$0xff]  ;;  %v964_v35 = vld [vmem:[%s3090_s3 + $0x10] sm:$0xff]  ;;  %v929_v1 = vunpack.c.l.bf16 %v913_v59  ;;  %v930_v2 = vunpack.c.h.bf16 %v913_v59  ;;  %v947_v13 = vunpack.c.l.bf16 %v3113_v0 }
 0x270   : > { %v970_v29 = vld [vmem:[%s3090_s3 + $0x40] sm:$0xff]  ;;  %v971_v30 = vld [vmem:[%s3090_s3 + $0x48] sm:$0xff]  ;;  %v972_v36 = vld [vmem:[%s3090_s3 + $0x50] sm:$0xff]  ;;  %v948_v14 = vunpack.c.h.bf16 %v3113_v0  ;;  %v949_v19 = vunpack.c.l.bf16 %v3119_v4  ;;  %v950_v20 = vunpack.c.h.bf16 %v3119_v4 }
 0x271   : > { %v981_v25 = vsub.s32 0, %v3084_v23  ;;  %v965_v39 = vld [vmem:[%s3090_s3 + $0x18] sm:$0xff]  ;;  %v966_v43 = vld [vmem:[%s3090_s3 + $0x20] sm:$0xff]  ;;  %v967_v47 = vld [vmem:[%s3090_s3 + $0x28] sm:$0xff]  ;;  %v1071_v60 = vsub.s32 1, %v3084_v23 }
 0x272   : > { %v973_v40 = vld [vmem:[%s3090_s3 + $0x58] sm:$0xff]  ;;  %v974_v44 = vld [vmem:[%s3090_s3 + $0x60] sm:$0xff]  ;;  %v975_v48 = vld [vmem:[%s3090_s3 + $0x68] sm:$0xff] }
 0x273   : > { %v982_v28 = vrot.slane %v978_v24, %v981_v25  ;;  %v968_v51 = vld [vmem:[%s3090_s3 + $0x30] sm:$0xff]  ;;  %v969_v55 = vld [vmem:[%s3090_s3 + $0x38] sm:$0xff]  ;;  %v1063_v61 = vld [vmem:[#allocation4] sm:$0x3] }
 0x274   : > { %v976_v52 = vld [vmem:[%s3090_s3 + $0x70] sm:$0xff]  ;;  %v977_v56 = vld [vmem:[%s3090_s3 + $0x78] sm:$0xff]  ;;  %v921_v63 = vld [vmem:[%s2903_s10 + $0x40] sm:$0xff]  ;;  %v3121_v5 = vrot.slane %v1063_v61, %v981_v25  ;;  %v3123_v6 = vrot.slane %v1063_v61, %v1071_v60 }
 0x275   : > { %v983_v31 = vmul.f32 %v982_v28, %v962_v26  ;;  %v984_v32 = vmul.f32 %v982_v28, %v963_v27  ;;  %v991_v33 = vmul.f32 %v982_v28, %v970_v29  ;;  %v992_v34 = vmul.f32 %v982_v28, %v971_v30  ;;  %v3126_v9 = vld [vmem:[%s2903_s10 + $0x18] sm:$0xff]  ;;  %v3134_v15 = vld [vmem:[%s2903_s10 + $0x20] sm:$0xff]  ;;  %v3144_v21 = vld [vmem:[%s2903_s10 + $0x28] sm:$0xff] }
 0x276   : > { %v985_v37 = vmul.f32 %v982_v28, %v964_v35  ;;  %v993_v38 = vmul.f32 %v982_v28, %v972_v36  ;;  %v986_v41 = vmul.f32 %v982_v28, %v965_v39  ;;  %v994_v42 = vmul.f32 %v982_v28, %v973_v40  ;;  %v3129_v10 = vld [vmem:[%s2903_s10 + $0x58] sm:$0xff]  ;;  %v3137_v16 = vld [vmem:[%s2903_s10 + $0x60] sm:$0xff]  ;;  %v3147_v22 = vld [vmem:[%s2903_s10 + $0x68] sm:$0xff] }
 0x277   : > { %999 = vadd.xlane.f32.xlu0 %v983_v31  ;;  %1001 = vadd.xlane.f32.xlu1 %v984_v32  ;;  %v987_v45 = vmul.f32 %v982_v28, %v966_v43  ;;  %v995_v46 = vmul.f32 %v982_v28, %v974_v44  ;;  %v988_v49 = vmul.f32 %v982_v28, %v967_v47  ;;  %v945_v11 = vunpack.c.l.bf16 %v921_v63  ;;  %v3158_v31 = vld [vmem:[%s2903_s10 + $0x30] sm:$0xff]  ;;  %v3168_v39 = vld [vmem:[%s2903_s10 + $0x38] sm:$0xff] }
 0x278   : > { %v996_v50 = vmul.f32 %v982_v28, %v975_v48  ;;  %v989_v53 = vmul.f32 %v982_v28, %v968_v51  ;;  %v997_v54 = vmul.f32 %v982_v28, %v976_v52  ;;  %v990_v57 = vmul.f32 %v982_v28, %v969_v55  ;;  %v3161_v32 = vld [vmem:[%s2903_s10 + $0x70] sm:$0xff]  ;;  %v3171_v44 = vld [vmem:[%s2903_s10 + $0x78] sm:$0xff] }
 0x279   : > { %v998_v58 = vmul.f32 %v982_v28, %v977_v56  ;;  %v946_v12 = vunpack.c.h.bf16 %v921_v63  ;;  %v935_v23 = vunpack.c.l.bf16 %v3126_v9  ;;  %v936_v24 = vunpack.c.h.bf16 %v3126_v9 }
 0x27a   : > { %v951_v25 = vunpack.c.l.bf16 %v3129_v10  ;;  %v952_v26 = vunpack.c.h.bf16 %v3129_v10  ;;  %v937_v27 = vunpack.c.l.bf16 %v3134_v15  ;;  %v938_v28 = vunpack.c.h.bf16 %v3134_v15 }
 0x27b   : > { %1015 = vadd.xlane.f32.xlu0 %v991_v33  ;;  %1017 = vadd.xlane.f32.xlu1 %v992_v34  ;;  %v953_v29 = vunpack.c.l.bf16 %v3137_v16  ;;  %v954_v30 = vunpack.c.h.bf16 %v3137_v16  ;;  %v939_v35 = vunpack.c.l.bf16 %v3144_v21  ;;  %v940_v36 = vunpack.c.h.bf16 %v3144_v21 }
 0x27c   : > { %v957_v47 = vunpack.c.l.bf16 %v3161_v32  ;;  %v958_v48 = vunpack.c.h.bf16 %v3161_v32  ;;  %v943_v51 = vunpack.c.l.bf16 %v3168_v39  ;;  %v944_v52 = vunpack.c.h.bf16 %v3168_v39 }
 0x27f   : > { %1003 = vadd.xlane.f32.xlu0 %v985_v37  ;;  %1019 = vadd.xlane.f32.xlu1 %v993_v38  ;;  %v955_v37 = vunpack.c.l.bf16 %v3147_v22  ;;  %v956_v38 = vunpack.c.h.bf16 %v3147_v22 }
 0x283   : > { %1005 = vadd.xlane.f32.xlu0 %v986_v41  ;;  %1021 = vadd.xlane.f32.xlu1 %v994_v42 }
 0x287   : > { %1007 = vadd.xlane.f32.xlu0 %v987_v45  ;;  %1023 = vadd.xlane.f32.xlu1 %v995_v46  ;;  %v941_v45 = vunpack.c.l.bf16 %v3158_v31  ;;  %v942_v46 = vunpack.c.h.bf16 %v3158_v31 }
 0x28b   : > { %1009 = vadd.xlane.f32.xlu0 %v988_v49  ;;  %1025 = vadd.xlane.f32.xlu1 %v996_v50 }
 0x28f   : > { %1011 = vadd.xlane.f32.xlu0 %v989_v53  ;;  %1027 = vadd.xlane.f32.xlu1 %v997_v54 }
 0x293   : > { %1013 = vadd.xlane.f32.xlu0 %v990_v57  ;;  %1029 = vadd.xlane.f32.xlu1 %v998_v58  ;;  %v959_v57 = vunpack.c.l.bf16 %v3171_v44  ;;  %v960_v58 = vunpack.c.h.bf16 %v3171_v44 }
 0x304   : > { %v1000_v33 = vpop.xlane.xlu0 %999  ;;  %v1002_v34 = vpop.xlane.xlu1 %1001 }
 0x305   : > { %v1031_v40 = vadd.f32 %v1000_v33, %v929_v1  ;;  %v1032_v41 = vadd.f32 %v1000_v33, %v930_v2  ;;  %v1033_v42 = vadd.f32 %v1002_v34, %v931_v7  ;;  %v1034_v43 = vadd.f32 %v1002_v34, %v932_v8 }
 0x307   : > { %v1075_v49 = vadd.f32 %v3121_v5, %v1031_v40  ;;  %v1076_v50 = vadd.f32 %v3123_v6, %v1032_v41  ;;  %v1077_v53 = vadd.f32 %v3121_v5, %v1033_v42  ;;  %v1078_v54 = vadd.f32 %v3123_v6, %v1034_v43 }
 0x308   : > { %v1016_v55 = vpop.xlane.xlu0 %1015  ;;  %v1018_v56 = vpop.xlane.xlu1 %1017 }
 0x309   : > { %v1047_v59 = vadd.f32 %v1016_v55, %v945_v11  ;;  %v1048_v60 = vadd.f32 %v1016_v55, %v946_v12  ;;  %v1049_v61 = vadd.f32 %v1018_v56, %v947_v13  ;;  %v1050_v62 = vadd.f32 %v1018_v56, %v948_v14 }
 0x30a   : > { %vm1107_vm1 = vcmp.ge.f32.partialorder %v1075_v49, 0.0  ;;  %vm1108_vm2 = vcmp.ge.f32.partialorder %v1076_v50, 0.0  ;;  %v1139_v63 = vmul.f32 0.2, %v1075_v49  ;;  %v1140_v0 = vmul.f32 0.2, %v1076_v50 }
 0x30b   : > { %v1091_v1 = vadd.f32 %v3121_v5, %v1047_v59  ;;  %v1092_v2 = vadd.f32 %v3123_v6, %v1048_v60  ;;  %v1093_v3 = vadd.f32 %v3121_v5, %v1049_v61  ;;  %v1094_v4 = vadd.f32 %v3123_v6, %v1050_v62 }
 0x30c   : > { %v1004_v7 = vpop.xlane.xlu0 %1003  ;;  %v1020_v8 = vpop.xlane.xlu1 %1019  ;;  %v3189_v33 = vsel %vm1107_vm1, %v1075_v49, %v1139_v63  ;;  %v3191_v11 = vsel %vm1108_vm2, %v1076_v50, %v1140_v0  ;;  %vm1109_vm3 = vcmp.ge.f32.partialorder %v1077_v53, 0.0  ;;  %vm1110_vm4 = vcmp.ge.f32.partialorder %v1078_v54, 0.0 }
 0x30d   : > { %v1035_v12 = vadd.f32 %v1004_v7, %v933_v17  ;;  %v1036_v13 = vadd.f32 %v1004_v7, %v934_v18  ;;  %v1051_v14 = vadd.f32 %v1020_v8, %v949_v19  ;;  %v1052_v34 = vadd.f32 %v1020_v8, %v950_v20 }
 0x30e   : > { %v1203_v40 = vmax.f32 %v3189_v33, %v3191_v11  ;;  %v1141_v41 = vmul.f32 0.2, %v1077_v53  ;;  %v1142_v42 = vmul.f32 0.2, %v1078_v54  ;;  %vm1123_vm5 = vcmp.ge.f32.partialorder %v1091_v1, 0.0 }
 0x30f   : > { %v1079_v43 = vadd.f32 %v3121_v5, %v1035_v12  ;;  %v1080_v55 = vadd.f32 %v3123_v6, %v1036_v13  ;;  %v3198_v49 = vadd.f32 %v3121_v5, %v1051_v14  ;;  %v3201_v50 = vadd.f32 %v3123_v6, %v1052_v34 }
 0x310   : > { %1204 = vmax.xlane.f32.xlu0 %v1203_v40  ;;  %v1006_v17 = vpop.xlane.xlu0 %1005  ;;  %v1022_v18 = vpop.xlane.xlu1 %1021  ;;  %v3204_v19 = vsel %vm1109_vm3, %v1077_v53, %v1141_v41  ;;  %v3207_v20 = vsel %vm1110_vm4, %v1078_v54, %v1142_v42  ;;  %vm1124_vm6 = vcmp.ge.f32.partialorder %v1092_v2, 0.0  ;;  %v1155_v56 = vmul.f32 0.2, %v1091_v1 }
 0x311   : > { %v1037_v59 = vadd.f32 %v1006_v17, %v935_v23  ;;  %v1038_v60 = vadd.f32 %v1006_v17, %v936_v24  ;;  %v1053_v61 = vadd.f32 %v1022_v18, %v951_v25  ;;  %v1054_v62 = vadd.f32 %v1022_v18, %v952_v26 }
 0x312   : > { %v1206_v53 = vmax.f32 %v3204_v19, %v3207_v20  ;;  %v1156_v63 = vmul.f32 0.2, %v1092_v2  ;;  %v3220_v54 = vsel %vm1123_vm5, %v1091_v1, %v1155_v56  ;;  %vm1125_vm7 = vcmp.ge.f32.partialorder %v1093_v3, 0.0 }
 0x313   : > { %v1081_v0 = vadd.f32 %v3121_v5, %v1037_v59  ;;  %v1082_v23 = vadd.f32 %v3123_v6, %v1038_v60  ;;  %v3225_v9 = vadd.f32 %v3121_v5, %v1053_v61  ;;  %v3228_v24 = vadd.f32 %v3123_v6, %v1054_v62 }
 0x314   : > { %1207 = vmax.xlane.f32.xlu0 %v1206_v53  ;;  %v3230_v10 = vsel %vm1124_vm6, %v1092_v2, %v1156_v63  ;;  %v1008_v25 = vpop.xlane.xlu0 %1007  ;;  %v1024_v26 = vpop.xlane.xlu1 %1023  ;;  %vm1126_vm8 = vcmp.ge.f32.partialorder %v1094_v4, 0.0  ;;  %v1157_v7 = vmul.f32 0.2, %v1093_v3  ;;  %v1158_v1 = vmul.f32 0.2, %v1094_v4 }
 0x315   : > { %v1227_v8 = vmax.f32 %v3220_v54, %v3230_v10  ;;  %v1039_v12 = vadd.f32 %v1008_v25, %v937_v27  ;;  %v1040_v13 = vadd.f32 %v1008_v25, %v938_v28  ;;  %v1055_v14 = vadd.f32 %v1024_v26, %v953_v29 }
 0x316   : > { %v1056_v2 = vadd.f32 %v1024_v26, %v954_v30  ;;  %v3243_v34 = vsel %vm1125_vm7, %v1093_v3, %v1157_v7  ;;  %v3245_v40 = vsel %vm1126_vm8, %v1094_v4, %v1158_v1  ;;  %vm1111_vm9 = vcmp.ge.f32.partialorder %v1079_v43, 0.0 }
 0x317   : > { %1228 = vmax.xlane.f32.xlu1 %v1227_v8  ;;  %v3248_v41 = vadd.f32 %v3121_v5, %v1039_v12  ;;  %v3251_v27 = vadd.f32 %v3123_v6, %v1040_v13  ;;  %v3254_v15 = vadd.f32 %v3121_v5, %v1055_v14  ;;  %v1230_v16 = vmax.f32 %v3243_v34, %v3245_v40 }
 0x318   : > { %v3259_v28 = vadd.f32 %v3123_v6, %v1056_v2  ;;  %vm1112_vm10 = vcmp.ge.f32.partialorder %v1080_v55, 0.0  ;;  %v1143_v29 = vmul.f32 0.2, %v1079_v43  ;;  %v1144_v30 = vmul.f32 0.2, %v1080_v55  ;;  %v1010_v3 = vpop.xlane.xlu0 %1009  ;;  %v1026_v4 = vpop.xlane.xlu1 %1025 }
 0x319   : > { %v1041_v42 = vadd.f32 %v1010_v3, %v939_v35  ;;  %v1042_v17 = vadd.f32 %v1010_v3, %v940_v36  ;;  %v1057_v18 = vadd.f32 %v1026_v4, %v955_v37  ;;  %v1058_v56 = vadd.f32 %v1026_v4, %v956_v38 }
 0x31a   : > { %v3270_v59 = vsel %vm1111_vm9, %v1079_v43, %v1143_v29  ;;  %v3272_v60 = vsel %vm1112_vm10, %v1080_v55, %v1144_v30  ;;  %vm1127_vm11 = vcmp.ge.f32.partialorder %v3198_v49, 0.0  ;;  %vm1128_vm12 = vcmp.ge.f32.partialorder %v3201_v50, 0.0 }
 0x31b   : > { %1231 = vmax.xlane.f32.xlu1 %v1230_v16  ;;  %v1209_v21 = vmax.f32 %v3270_v59, %v3272_v60  ;;  %v3279_v35 = vadd.f32 %v3121_v5, %v1041_v42  ;;  %v3282_v36 = vadd.f32 %v3123_v6, %v1042_v17  ;;  %v3285_v22 = vadd.f32 %v3121_v5, %v1057_v18 }
 0x31c   : > { %v3288_v37 = vadd.f32 %v3123_v6, %v1058_v56  ;;  %v1159_v38 = vmul.f32 0.2, %v3198_v49  ;;  %v1160_v43 = vmul.f32 0.2, %v3201_v50  ;;  %vm1113_vm13 = vcmp.ge.f32.partialorder %v1081_v0, 0.0  ;;  %v1012_v55 = vpop.xlane.xlu0 %1011  ;;  %v1028_v61 = vpop.xlane.xlu1 %1027 }
 0x31d   : > { %1210 = vmax.xlane.f32.xlu0 %v1209_v21  ;;  %vm1114_vm14 = vcmp.ge.f32.partialorder %v1082_v23, 0.0  ;;  %v1145_v62 = vmul.f32 0.2, %v1081_v0  ;;  %v1146_v53 = vmul.f32 0.2, %v1082_v23  ;;  %v1043_v63 = vadd.f32 %v1012_v55, %v941_v45 }
 0x31e   : > { %v3297_v25 = vsel %vm1127_vm11, %v3198_v49, %v1159_v38  ;;  %v3302_v26 = vsel %vm1128_vm12, %v3201_v50, %v1160_v43  ;;  %v1044_v7 = vadd.f32 %v1012_v55, %v942_v46  ;;  %v1059_v1 = vadd.f32 %v1028_v61, %v957_v47 }
 0x31f   : > { %v1233_v8 = vmax.f32 %v3297_v25, %v3302_v26  ;;  %v3310_v45 = vsel %vm1113_vm13, %v1081_v0, %v1145_v62  ;;  %v3312_v12 = vsel %vm1114_vm14, %v1082_v23, %v1146_v53  ;;  %v3315_v49 = vadd.f32 %v3121_v5, %v1043_v63 }
 0x320   : > { %v1212_v50 = vmax.f32 %v3310_v45, %v3312_v12  ;;  %v3320_v13 = vadd.f32 %v3123_v6, %v1044_v7  ;;  %v1060_v31 = vadd.f32 %v1028_v61, %v958_v48  ;;  %v3325_v46 = vadd.f32 %v3121_v5, %v1059_v1  ;;  %v1014_v47 = vpop.xlane.xlu0 %1013  ;;  %v1030_v14 = vpop.xlane.xlu1 %1029 }
 0x321   : > { %1234 = vmax.xlane.f32.xlu1 %v1233_v8  ;;  %vm1129_vm15 = vcmp.ge.f32.partialorder %v3225_v9, 0.0  ;;  %vm1130_vm0 = vcmp.ge.f32.partialorder %v3228_v24, 0.0  ;;  %v1161_v0 = vmul.f32 0.2, %v3225_v9  ;;  %v1162_v23 = vmul.f32 0.2, %v3228_v24 }
 0x322   : > { %1213 = vmax.xlane.f32.xlu0 %v1212_v50  ;;  %v1104_v2 = vadd.f32 %v3123_v6, %v1060_v31  ;;  %vm1115_vm1 = vcmp.ge.f32.partialorder %v3248_v41, 0.0  ;;  %vm1116_vm2 = vcmp.ge.f32.partialorder %v3251_v27, 0.0  ;;  %v1147_v32 = vmul.f32 0.2, %v3248_v41 }
 0x323   : > { %v3336_v48 = vsel %vm1129_vm15, %v3225_v9, %v1161_v0  ;;  %v3339_v16 = vsel %vm1130_vm0, %v3228_v24, %v1162_v23  ;;  %v1148_v29 = vmul.f32 0.2, %v3251_v27  ;;  %v1045_v30 = vadd.f32 %v1014_v47, %v943_v51 }
 0x324   : > { %v1236_v3 = vmax.f32 %v3336_v48, %v3339_v16  ;;  %v3347_v4 = vsel %vm1115_vm1, %v3248_v41, %v1147_v32  ;;  %v1046_v42 = vadd.f32 %v1014_v47, %v944_v52  ;;  %v1061_v9 = vadd.f32 %v1030_v14, %v959_v57 }
 0x325   : > { %v3354_v24 = vsel %vm1116_vm2, %v3251_v27, %v1148_v29  ;;  %v1089_v17 = vadd.f32 %v3121_v5, %v1045_v30  ;;  %v1062_v51 = vadd.f32 %v1030_v14, %v960_v58  ;;  %vm1131_vm3 = vcmp.ge.f32.partialorder %v3254_v15, 0.0  ;;  %v1459_v29 = vld [vmem:[#allocation2 + $0x80] sm:$0xff]  ;;  %v1460_v30 = vld [vmem:[#allocation2 + $0x88] sm:$0xff] }
 0x326   : > { %1237 = vmax.xlane.f32.xlu1 %v1236_v3  ;;  %v1215_v41 = vmax.f32 %v3347_v4, %v3354_v24  ;;  %v1090_v39 = vadd.f32 %v3123_v6, %v1046_v42  ;;  %v1105_v52 = vadd.f32 %v3121_v5, %v1061_v9  ;;  %vm1132_vm4 = vcmp.ge.f32.partialorder %v3259_v28, 0.0  ;;  %v1443_v3 = vld [vmem:[#allocation2] sm:$0xff]  ;;  %v1444_v9 = vld [vmem:[#allocation2 + $0x8] sm:$0xff] }
 0x327   : > { %v1106_v57 = vadd.f32 %v3123_v6, %v1062_v51  ;;  %v1163_v27 = vmul.f32 0.2, %v3254_v15  ;;  %v1164_v18 = vmul.f32 0.2, %v3259_v28  ;;  %vm1117_vm5 = vcmp.ge.f32.partialorder %v3279_v35, 0.0  ;;  %v1462_v51 = vld [vmem:[#allocation2 + $0x98] sm:$0xff] }
 0x328   : > { %1216 = vmax.xlane.f32.xlu0 %v1215_v41  ;;  %vm1118_vm6 = vcmp.ge.f32.partialorder %v3282_v36, 0.0  ;;  %v1149_v44 = vmul.f32 0.2, %v3279_v35  ;;  %v1150_v58 = vmul.f32 0.2, %v3282_v36  ;;  %vm1133_vm7 = vcmp.ge.f32.partialorder %v3285_v22, 0.0 }
 0x329   : > { %v3374_v5 = vsel %vm1131_vm3, %v3254_v15, %v1163_v27  ;;  %v3377_v6 = vsel %vm1132_vm4, %v3259_v28, %v1164_v18  ;;  %vm1134_vm8 = vcmp.ge.f32.partialorder %v3288_v37, 0.0  ;;  %v1165_v56 = vmul.f32 0.2, %v3285_v22  ;;  %v1445_v27 = vld [vmem:[#allocation2 + $0x10] sm:$0xff]  ;;  %v1463_v18 = vld [vmem:[#allocation2 + $0xa0] sm:$0xff] }
 0x32a   : > { %v1239_v21 = vmax.f32 %v3374_v5, %v3377_v6  ;;  %v3384_v38 = vsel %vm1117_vm5, %v3279_v35, %v1149_v44  ;;  %v3387_v43 = vsel %vm1118_vm6, %v3282_v36, %v1150_v58  ;;  %v1166_v55 = vmul.f32 0.2, %v3288_v37 }
 0x32b   : > { %v1218_v15 = vmax.f32 %v3384_v38, %v3387_v43  ;;  %v3393_v28 = vsel %vm1133_vm7, %v3285_v22, %v1165_v56  ;;  %vm1119_vm9 = vcmp.ge.f32.partialorder %v3315_v49, 0.0  ;;  %vm1120_vm10 = vcmp.ge.f32.partialorder %v3320_v13, 0.0  ;;  %v1447_v56 = vld [vmem:[#allocation2 + $0x20] sm:$0xff] }
 0x32c   : > { %1240 = vmax.xlane.f32.xlu1 %v1239_v21  ;;  %v3398_v61 = vsel %vm1134_vm8, %v3288_v37, %v1166_v55  ;;  %v1151_v35 = vmul.f32 0.2, %v3315_v49  ;;  %v1152_v36 = vmul.f32 0.2, %v3320_v13  ;;  %vm1135_vm11 = vcmp.ge.f32.partialorder %v3325_v46, 0.0  ;;  %v1448_v21 = vld [vmem:[#allocation2 + $0x28] sm:$0xff] }
 0x32d   : > { %1219 = vmax.xlane.f32.xlu0 %v1218_v15  ;;  %v1242_v62 = vmax.f32 %v3393_v28, %v3398_v61  ;;  %vm1136_vm12 = vcmp.ge.f32.partialorder %v1104_v2, 0.0  ;;  %v1167_v22 = vmul.f32 0.2, %v3325_v46  ;;  %v1168_v53 = vmul.f32 0.2, %v1104_v2  ;;  %v1465_v55 = vld [vmem:[#allocation2 + $0xb0] sm:$0xff] }
 0x32e   : > { %v3407_v63 = vsel %vm1119_vm9, %v3315_v49, %v1151_v35  ;;  %v3410_v37 = vsel %vm1120_vm10, %v3320_v13, %v1152_v36  ;;  %vm1121_vm13 = vcmp.ge.f32.partialorder %v1089_v17, 0.0  ;;  %vm1122_vm14 = vcmp.ge.f32.partialorder %v1090_v39, 0.0  ;;  %v1466_v15 = vld [vmem:[#allocation2 + $0xb8] sm:$0xff] }
 0x32f   : > { %v1221_v7 = vmax.f32 %v3407_v63, %v3410_v37  ;;  %v3415_v1 = vsel %vm1135_vm11, %v3325_v46, %v1167_v22  ;;  %v3417_v8 = vsel %vm1136_vm12, %v1104_v2, %v1168_v53  ;;  %v1153_v50 = vmul.f32 0.2, %v1089_v17  ;;  %v1450_v22 = vld [vmem:[#allocation2 + $0x38] sm:$0xff]  ;;  %v1467_v53 = vld [vmem:[#allocation2 + $0xc0] sm:$0xff] }
 0x330   : > { %1243 = vmax.xlane.f32.xlu1 %v1242_v62  ;;  %v1154_v31 = vmul.f32 0.2, %v1090_v39  ;;  %vm1137_vm15 = vcmp.ge.f32.partialorder %v1105_v52, 0.0  ;;  %vm1138_vm0 = vcmp.ge.f32.partialorder %v1106_v57, 0.0  ;;  %v1169_v13 = vmul.f32 0.2, %v1105_v52 }
 0x331   : > { %1222 = vmax.xlane.f32.xlu0 %v1221_v7  ;;  %v3419_v49 = vsel %vm1121_vm13, %v1089_v17, %v1153_v50  ;;  %v1170_v47 = vmul.f32 0.2, %v1106_v57  ;;  %v1245_v0 = vmax.f32 %v3415_v1, %v3417_v8  ;;  %v2510_v42 = vpack.c.bf16 %v1460_v30, %v1459_v29  ;;  %v1461_v17 = vld [vmem:[#allocation2 + $0x90] sm:$0xff]  ;;  %v1468_v7 = vld [vmem:[#allocation2 + $0xc8] sm:$0xff] }
 0x332   : > { %v3423_v23 = vsel %vm1122_vm14, %v1090_v39, %v1154_v31  ;;  %v3427_v14 = vsel %vm1137_vm15, %v1105_v52, %v1169_v13  ;;  %v2512_v41 = vpack.c.bf16 %v1444_v9, %v1443_v3  ;;  %v2514_v39 = vpack.c.bf16 %v1462_v51, %v1461_v17  ;;  %v1446_v52 = vld [vmem:[#allocation2 + $0x18] sm:$0xff]  ;;  %v1449_v62 = vld [vmem:[#allocation2 + $0x30] sm:$0xff]  ;;  %v1451_v13 = vld [vmem:[#allocation2 + $0x40] sm:$0xff] }
 0x333   : > { %v1224_v46 = vmax.f32 %v3419_v49, %v3423_v23  ;;  %v3429_v2 = vsel %vm1138_vm0, %v1106_v57, %v1170_v47  ;;  %2511 = vmatprep.subr.bf16.mxu0 %v2510_v42  ;;  %2566 = vmatprep.subr.bf16.mxu1 %v2510_v42  ;;  %v1464_v57 = vld [vmem:[#allocation2 + $0xa8] sm:$0xff]  ;;  %v2516_v44 = vpack.c.bf16 %v1446_v52, %v1445_v27  ;;  %vm2800_vm1 = vmmov (!%p2148_p12), 0  }
 0x334   : > { %1246 = vmax.xlane.f32.xlu1 %v1245_v0  ;;  %v1248_v32 = vmax.f32 %v3427_v14, %v3429_v2  ;;  %2513 = vmatpush3.bf16.msra.mxu0 %v2512_v41  ;;  %v2518_v58 = vpack.c.bf16 %v1464_v57, %v1463_v18  ;;  %v2520_v35 = vpack.c.bf16 %v1448_v21, %v1447_v56  ;;  %v1452_v47 = vld [vmem:[#allocation2 + $0x48] sm:$0xff] }
 0x335   : > { %1225 = vmax.xlane.f32.xlu0 %v1224_v46  ;;  %2574 = vmatpush3.bf16.msra.mxu1 %v2512_v41  ;;  %v2522_v36 = vpack.c.bf16 %v1466_v15, %v1465_v55  ;;  %v2524_v50 = vpack.c.bf16 %v1450_v22, %v1449_v62  ;;  %v2526_v31 = vpack.c.bf16 %v1468_v7, %v1467_v53 }
 0x336   : > { %2515 = vmatprep.subr.bf16.mxu0 %v2514_v39  ;;  %2567 = vmatprep.subr.bf16.mxu1 %v2514_v39  ;;  %v2528_v0 = vpack.c.bf16 %v1452_v47, %v1451_v13 }
 0x338   : > { %1249 = vmax.xlane.f32.xlu1 %v1248_v32  ;;  %2517 = vmatpush3.bf16.msra.mxu0 %v2516_v44 }
 0x339   : > { %2575 = vmatpush3.bf16.msra.mxu1 %v2516_v44  ;;  %2519 = vmatprep.subr.bf16.mxu0 %v2518_v58 }
 0x33a   : > { %2568 = vmatprep.subr.bf16.mxu1 %v2518_v58 }
 0x33c   : > { %2521 = vmatpush3.bf16.msra.mxu0 %v2520_v35 }
 0x33d   : > { %2576 = vmatpush3.bf16.msra.mxu1 %v2520_v35  ;;  %2523 = vmatprep.subr.bf16.mxu0 %v2522_v36 }
 0x33e   : > { %2569 = vmatprep.subr.bf16.mxu1 %v2522_v36 }
 0x340   : > { %2525 = vmatpush3.bf16.msra.mxu0 %v2524_v50 }
 0x341   : > { %2577 = vmatpush3.bf16.msra.mxu1 %v2524_v50  ;;  %2527 = vmatprep.subr.bf16.mxu0 %v2526_v31 }
 0x342   : > { %2570 = vmatprep.subr.bf16.mxu1 %v2526_v31 }
 0x344   : > { %2529 = vmatpush3.bf16.msra.mxu0 %v2528_v0 }
 0x345   : > { %2578 = vmatpush3.bf16.msra.mxu1 %v2528_v0 }
 0x39d   : > { %v1205_v46 = vpop.xlane.xlu0 %1204 }
 0x39e   : > { %v1251_v32 = vsub.f32 %v3189_v33, %v1205_v46  ;;  %v1252_v29 = vsub.f32 %v3191_v11, %v1205_v46 }
 0x3a0   : > { %v1283_v30 = vmul.f32 1.442695, %v1251_v32  ;;  %v1285_v3 = vmul.f32 1.442695, %v1252_v29 }
 0x3a1   : > { %v1208_v42 = vpop.xlane.xlu0 %1207 }
 0x3a2   : > { %2627 = vpow2.f32 %v1283_v30  ;;  %v1253_v9 = vsub.f32 %v3204_v19, %v1208_v42  ;;  %v1254_v17 = vsub.f32 %v3207_v20, %v1208_v42 }
 0x3a3   : > { %2629 = vpow2.f32 %v1285_v3 }
 0x3a4   : > { %v1229_v51 = vpop.xlane.xlu1 %1228  ;;  %v1287_v41 = vmul.f32 1.442695, %v1253_v9  ;;  %v1289_v39 = vmul.f32 1.442695, %v1254_v17 }
 0x3a5   : > { %v1267_v27 = vsub.f32 %v3220_v54, %v1229_v51  ;;  %v1268_v52 = vsub.f32 %v3230_v10, %v1229_v51 }
 0x3a6   : > { %2631 = vpow2.f32 %v1287_v41 }
 0x3a7   : > { %v1315_v33 = vmul.f32 1.442695, %v1267_v27  ;;  %v1317_v18 = vmul.f32 1.442695, %v1268_v52  ;;  %2633 = vpow2.f32 %v1289_v39 }
 0x3a8   : > { %v1232_v11 = vpop.xlane.xlu1 %1231 }
 0x3a9   : > { %2635 = vpow2.f32 %v1315_v33  ;;  %v1269_v57 = vsub.f32 %v3243_v34, %v1232_v11  ;;  %v1270_v19 = vsub.f32 %v3245_v40, %v1232_v11 }
 0x3aa   : > { %2637 = vpow2.f32 %v1317_v18  ;;  %v1211_v20 = vpop.xlane.xlu0 %1210 }
 0x3ab   : > { %v1319_v44 = vmul.f32 1.442695, %v1269_v57  ;;  %v1321_v58 = vmul.f32 1.442695, %v1270_v19  ;;  %v1255_v56 = vsub.f32 %v3270_v59, %v1211_v20  ;;  %v1256_v54 = vsub.f32 %v3272_v60, %v1211_v20 }
 0x3ac   : > { %v3443_v21 = vpop.eup %2627 }
 0x3ad   : > { %v3445_v10 = vpop.eup %2629  ;;  %2639 = vpow2.f32 %v1319_v44  ;;  %v1291_v55 = vmul.f32 1.442695, %v1255_v56  ;;  %v1293_v15 = vmul.f32 1.442695, %v1256_v54  ;;  %v1469_v54 = vld [vmem:[#allocation2 + $0xd0] sm:$0xff] }
 0x3ae   : > { %2641 = vpow2.f32 %v1321_v58  ;;  %v1235_v35 = vpop.xlane.xlu1 %1234  ;;  %v1347_v34 = vadd.f32 %v3445_v10, %v3443_v21 }
 0x3af   : > { %2643 = vpow2.f32 %v1291_v55  ;;  %v1271_v40 = vsub.f32 %v3297_v25, %v1235_v35  ;;  %v1272_v36 = vsub.f32 %v3302_v26, %v1235_v35  ;;  %v1214_v59 = vpop.xlane.xlu0 %1213  ;;  %v1470_v55 = vld [vmem:[#allocation2 + $0xd8] sm:$0xff] }
 0x3b0   : > { %v3451_v62 = vpop.eup %2631  ;;  %2645 = vpow2.f32 %v1293_v15  ;;  %v1257_v60 = vsub.f32 %v3310_v45, %v1214_v59  ;;  %v1258_v22 = vsub.f32 %v3312_v12, %v1214_v59  ;;  %1348 = vadd.xlane.f32.xlu0 %v1347_v34  ;;  %v1454_v59 = vld [vmem:[#allocation2 + $0x58] sm:$0xff] }
 0x3b1   : > { %v3455_v53 = vpop.eup %2633  ;;  %v1323_v7 = vmul.f32 1.442695, %v1271_v40  ;;  %v1325_v50 = vmul.f32 1.442695, %v1272_v36  ;;  %v1453_v36 = vld [vmem:[#allocation2 + $0x50] sm:$0xff] }
 0x3b2   : > { %v1295_v31 = vmul.f32 1.442695, %v1257_v60  ;;  %v1297_v13 = vmul.f32 1.442695, %v1258_v22  ;;  %v1350_v25 = vadd.f32 %v3455_v53, %v3451_v62  ;;  %v2530_v22 = vpack.c.bf16 %v1470_v55, %v1469_v54 }
 0x3b3   : > { %v3459_v47 = vpop.eup %2635  ;;  %2647 = vpow2.f32 %v1323_v7  ;;  %v1238_v26 = vpop.xlane.xlu1 %1237 }
 0x3b4   : > { %v3461_v0 = vpop.eup %2637  ;;  %2649 = vpow2.f32 %v1325_v50  ;;  %v1273_v45 = vsub.f32 %v3336_v48, %v1238_v26  ;;  %v1274_v12 = vsub.f32 %v3339_v16, %v1238_v26  ;;  %1351 = vadd.xlane.f32.xlu0 %v1350_v25  ;;  %2531 = vmatprep.subr.bf16.mxu0 %v2530_v22 }
 0x3b5   : > { %2651 = vpow2.f32 %v1295_v31  ;;  %v1217_v46 = vpop.xlane.xlu0 %1216  ;;  %v1371_v32 = vadd.f32 %v3461_v0, %v3459_v47  ;;  %2571 = vmatprep.subr.bf16.mxu1 %v2530_v22 }
 0x3b6   : > { %2653 = vpow2.f32 %v1297_v13  ;;  %v1327_v29 = vmul.f32 1.442695, %v1273_v45  ;;  %v1329_v30 = vmul.f32 1.442695, %v1274_v12  ;;  %v1259_v3 = vsub.f32 %v3347_v4, %v1217_v46 }
 0x3b7   : > { %v3468_v42 = vpop.eup %2639  ;;  %v1260_v9 = vsub.f32 %v3354_v24, %v1217_v46  ;;  %1372 = vadd.xlane.f32.xlu1 %v1371_v32  ;;  %v2532_v45 = vpack.c.bf16 %v1454_v59, %v1453_v36 }
 0x3b8   : > { %v3471_v17 = vpop.eup %2641  ;;  %2655 = vpow2.f32 %v1327_v29  ;;  %v1299_v48 = vmul.f32 1.442695, %v1259_v3 }
 0x3b9   : > { %v3473_v16 = vpop.eup %2643  ;;  %2657 = vpow2.f32 %v1329_v30  ;;  %v1301_v51 = vmul.f32 1.442695, %v1260_v9  ;;  %v1241_v41 = vpop.xlane.xlu1 %1240  ;;  %v1374_v39 = vadd.f32 %v3471_v17, %v3468_v42  ;;  %2533 = vmatpush3.bf16.msra.mxu0 %v2532_v45  ;;  %2579 = vmatpush3.bf16.msra.mxu1 %v2532_v45 }
 0x3ba   : > { %v3477_v27 = vpop.eup %2645  ;;  %2659 = vpow2.f32 %v1299_v48  ;;  %v1275_v4 = vsub.f32 %v3374_v5, %v1241_v41  ;;  %v1276_v24 = vsub.f32 %v3377_v6, %v1241_v41  ;;  %v1220_v52 = vpop.xlane.xlu0 %1219  ;;  %v1472_v41 = vld [vmem:[#allocation2 + $0xe8] sm:$0xff] }
 0x3bb   : > { %2661 = vpow2.f32 %v1301_v51  ;;  %v1261_v33 = vsub.f32 %v3384_v38, %v1220_v52  ;;  %v1262_v18 = vsub.f32 %v3387_v43, %v1220_v52  ;;  %1375 = vadd.xlane.f32.xlu1 %v1374_v39  ;;  %v1353_v11 = vadd.f32 %v3477_v27, %v3473_v16  ;;  %v1456_v52 = vld [vmem:[#allocation2 + $0x68] sm:$0xff] }
 0x3bc   : > { %v1331_v57 = vmul.f32 1.442695, %v1275_v4  ;;  %v1333_v19 = vmul.f32 1.442695, %v1276_v24  ;;  %v1455_v24 = vld [vmem:[#allocation2 + $0x60] sm:$0xff] }
 0x3bd   : > { %v3485_v20 = vpop.eup %2647  ;;  %v1303_v44 = vmul.f32 1.442695, %v1261_v33  ;;  %v1305_v58 = vmul.f32 1.442695, %v1262_v18  ;;  %v1244_v56 = vpop.xlane.xlu1 %1243  ;;  %1354 = vadd.xlane.f32.xlu0 %v1353_v11  ;;  %v2536_v18 = vpack.c.bf16 %v1456_v52, %v1455_v24 }
 0x3be   : > { %v3487_v5 = vpop.eup %2649  ;;  %2663 = vpow2.f32 %v1331_v57  ;;  %v1277_v6 = vsub.f32 %v3393_v28, %v1244_v56  ;;  %v1278_v38 = vsub.f32 %v3398_v61, %v1244_v56  ;;  %v1223_v43 = vpop.xlane.xlu0 %1222  ;;  %v1473_v56 = vld [vmem:[#allocation2 + $0xf0] sm:$0xff] }
 0x3bf   : > { %v3491_v15 = vpop.eup %2651  ;;  %2665 = vpow2.f32 %v1333_v19  ;;  %v1263_v35 = vsub.f32 %v3407_v63, %v1223_v43  ;;  %v1264_v34 = vsub.f32 %v3410_v37, %v1223_v43  ;;  %v1377_v40 = vadd.f32 %v3487_v5, %v3485_v20 }
 0x3c0   : > { %v3497_v60 = vpop.eup %2653  ;;  %2667 = vpow2.f32 %v1303_v44  ;;  %v1335_v28 = vmul.f32 1.442695, %v1277_v6  ;;  %v1337_v61 = vmul.f32 1.442695, %v1278_v38  ;;  %v1474_v6 = vld [vmem:[#allocation2 + $0xf8] sm:$0xff]  ;;  %v1457_v38 = vld [vmem:[#allocation2 + $0x70] sm:$0xff] }
 0x3c1   : > { %2669 = vpow2.f32 %v1305_v58  ;;  %v1307_v7 = vmul.f32 1.442695, %v1263_v35  ;;  %v1309_v50 = vmul.f32 1.442695, %v1264_v34  ;;  %v1247_v31 = vpop.xlane.xlu1 %1246  ;;  %1378 = vadd.xlane.f32.xlu1 %v1377_v40  ;;  %v1356_v63 = vadd.f32 %v3497_v60, %v3491_v15  ;;  %v1458_v35 = vld [vmem:[#allocation2 + $0x78] sm:$0xff] }
 0x3c2   : > { %v3501_v37 = vpop.eup %2655  ;;  %2671 = vpow2.f32 %v1335_v28  ;;  %v1279_v13 = vsub.f32 %v3415_v1, %v1247_v31  ;;  %v1280_v25 = vsub.f32 %v3417_v8, %v1247_v31  ;;  %v1226_v26 = vpop.xlane.xlu0 %1225  ;;  %v2538_v55 = vpack.c.bf16 %v1474_v6, %v1473_v56 }
 0x3c3   : > { %v3505_v12 = vpop.eup %2657  ;;  %2673 = vpow2.f32 %v1337_v61  ;;  %v1265_v46 = vsub.f32 %v3419_v49, %v1226_v26  ;;  %v1266_v32 = vsub.f32 %v3423_v23, %v1226_v26  ;;  %1357 = vadd.xlane.f32.xlu0 %v1356_v63  ;;  %v1471_v49 = vld [vmem:[#allocation2 + $0xe0] sm:$0xff]  ;;  %v2540_v40 = vpack.c.bf16 %v1458_v35, %v1457_v38 }
 0x3c4   : > { %v3509_v29 = vpop.eup %2659  ;;  %2675 = vpow2.f32 %v1307_v7  ;;  %v1339_v30 = vmul.f32 1.442695, %v1279_v13  ;;  %v1341_v3 = vmul.f32 1.442695, %v1280_v25  ;;  %v1380_v1 = vadd.f32 %v3505_v12, %v3501_v37 }
 0x3c5   : > { %v3513_v8 = vpop.eup %2661  ;;  %2677 = vpow2.f32 %v1309_v50  ;;  %v1311_v9 = vmul.f32 1.442695, %v1265_v46  ;;  %v1313_v48 = vmul.f32 1.442695, %v1266_v32  ;;  %v1250_v51 = vpop.xlane.xlu1 %1249  ;;  %v2534_v33 = vpack.c.bf16 %v1472_v41, %v1471_v49 }
 0x3c6   : > { %2679 = vpow2.f32 %v1339_v30  ;;  %v1281_v23 = vsub.f32 %v3427_v14, %v1250_v51  ;;  %v1282_v39 = vsub.f32 %v3429_v2, %v1250_v51  ;;  %1381 = vadd.xlane.f32.xlu1 %v1380_v1  ;;  %v1359_v4 = vadd.f32 %v3513_v8, %v3509_v29 }
 0x3c7   : > { %2681 = vpow2.f32 %v1341_v3  ;;  %2535 = vmatprep.subr.bf16.mxu0 %v2534_v33  ;;  %2572 = vmatprep.subr.bf16.mxu1 %v2534_v33 }
 0x3c8   : > { %v3519_v11 = vpop.eup %2663  ;;  %2683 = vpow2.f32 %v1311_v9  ;;  %v1343_v57 = vmul.f32 1.442695, %v1281_v23  ;;  %v1345_v19 = vmul.f32 1.442695, %v1282_v39  ;;  %1360 = vadd.xlane.f32.xlu0 %v1359_v4  ;;  %2537 = vmatpush3.bf16.msra.mxu0 %v2536_v18 }
 0x3c9   : > { %v3521_v44 = vpop.eup %2665  ;;  %2685 = vpow2.f32 %v1313_v48  ;;  %2580 = vmatpush3.bf16.msra.mxu1 %v2536_v18  ;;  %2539 = vmatprep.subr.bf16.mxu0 %v2538_v55 }
 0x3ca   : > { %v3523_v14 = vpop.eup %2667  ;;  %2687 = vpow2.f32 %v1343_v57  ;;  %v1383_v2 = vadd.f32 %v3521_v44, %v3519_v11  ;;  %2573 = vmatprep.subr.bf16.mxu1 %v2538_v55 }
 0x3cb   : > { %v3527_v58 = vpop.eup %2669  ;;  %2689 = vpow2.f32 %v1345_v19 }
 0x3cc   : > { %v3529_v43 = vpop.eup %2671  ;;  %1384 = vadd.xlane.f32.xlu1 %v1383_v2  ;;  %v1362_v54 = vadd.f32 %v3527_v58, %v3523_v14  ;;  %2541 = vmatpush3.bf16.msra.mxu0 %v2540_v40 }
 0x3cd   : > { %v3533_v34 = vpop.eup %2673  ;;  %2581 = vmatpush3.bf16.msra.mxu1 %v2540_v40 }
 0x3ce   : > { %v3535_v36 = vpop.eup %2675  ;;  %1363 = vadd.xlane.f32.xlu0 %v1362_v54  ;;  %v1386_v59 = vadd.f32 %v3533_v34, %v3529_v43 }
 0x3cf   : > { %v3539_v28 = vpop.eup %2677 }
 0x3d0   : > { %v3541_v61 = vpop.eup %2679  ;;  %1387 = vadd.xlane.f32.xlu1 %v1386_v59  ;;  %v1365_v22 = vadd.f32 %v3539_v28, %v3535_v36 }
 0x3d1   : > { %v3545_v7 = vpop.eup %2681 }
 0x3d2   : > { %v3547_v50 = vpop.eup %2683  ;;  %1366 = vadd.xlane.f32.xlu0 %v1365_v22  ;;  %v1389_v31 = vadd.f32 %v3545_v7, %v3541_v61 }
 0x3d3   : > { %v3551_v63 = vpop.eup %2685 }
 0x3d4   : > { %v3553_v13 = vpop.eup %2687  ;;  %1390 = vadd.xlane.f32.xlu1 %v1389_v31  ;;  %v1368_v25 = vadd.f32 %v3551_v63, %v3547_v50 }
 0x3d5   : > { %v3557_v26 = vpop.eup %2689 }
 0x3d6   : > { %1369 = vadd.xlane.f32.xlu0 %v1368_v25  ;;  %v1392_v45 = vadd.f32 %v3557_v26, %v3553_v13 }
 0x3d8   : > { %1393 = vadd.xlane.f32.xlu1 %v1392_v45 }
 0x43d   : > { %v1349_v46 = vpop.xlane.xlu0 %1348 }
 0x43e   : > { %2691 = vrcp.f32 %v1349_v46 }
 0x441   : > { %v1352_v32 = vpop.xlane.xlu0 %1351 }
 0x442   : > { %2693 = vrcp.f32 %v1352_v32 }
 0x444   : > { %v1373_v30 = vpop.xlane.xlu1 %1372 }
 0x445   : > { %2695 = vrcp.f32 %v1373_v30 }
 0x448   : > { %v2692_v3 = vpop.eup %2691  ;;  %v1376_v1 = vpop.xlane.xlu1 %1375 }
 0x449   : > { %2697 = vrcp.f32 %v1376_v1  ;;  %v1412_v9 = vmul.f32 %v2692_v3, %v3445_v10  ;;  %v1411_v48 = vmul.f32 %v2692_v3, %v3443_v21 }
 0x44a   : > { %v1355_v51 = vpop.xlane.xlu0 %1354 }
 0x44b   : > { %2699 = vrcp.f32 %v1355_v51  ;;  %1546 = vmatprep.mubr.f32.mxu0 %v1412_v9 }
 0x44c   : > { %v2694_v49 = vpop.eup %2693  ;;  %1547 = vmatmul.mubr.f32.vlgmr.msra.gmra.mrb[0].mxu0 %v1411_v48 }
 0x44d   : > { %v1414_v41 = vmul.f32 %v2694_v49, %v3455_v53  ;;  %v1413_v23 = vmul.f32 %v2694_v49, %v3451_v62 }
 0x44e   : > { %v1379_v39 = vpop.xlane.xlu1 %1378 }
 0x44f   : > { %v2696_v4 = vpop.eup %2695  ;;  %2701 = vrcp.f32 %v1379_v39  ;;  %1551 = vmatprep.mubr.f32.mxu0 %v1414_v41 }
 0x450   : > { %v1358_v24 = vpop.xlane.xlu0 %1357  ;;  %v1428_v52 = vmul.f32 %v2696_v4, %v3461_v0  ;;  %1552 = vmatmul.mubr.f32.gmra.mrb[2].mxu0 %v1413_v23  ;;  %v1427_v10 = vmul.f32 %v2696_v4, %v3459_v47 }
 0x451   : > { %2703 = vrcp.f32 %v1358_v24 }
 0x452   : > { %1586 = vmatprep.mubr.f32.mxu1 %v1428_v52 }
 0x453   : > { %v2698_v21 = vpop.eup %2697  ;;  %v1382_v33 = vpop.xlane.xlu1 %1381  ;;  %1587 = vmatmul.mubr.f32.vlgmr.msra.gmra.mrb[0].mxu1 %v1427_v10 }
 0x454   : > { %2705 = vrcp.f32 %v1382_v33  ;;  %v1430_v53 = vmul.f32 %v2698_v21, %v3471_v17  ;;  %v1429_v62 = vmul.f32 %v2698_v21, %v3468_v42 }
 0x455   : > { %v2700_v18 = vpop.eup %2699  ;;  %v1361_v57 = vpop.xlane.xlu0 %1360 }
 0x456   : > { %2707 = vrcp.f32 %v1361_v57  ;;  %v1416_v19 = vmul.f32 %v2700_v18, %v3477_v27  ;;  %1591 = vmatprep.mubr.f32.mxu1 %v1430_v53  ;;  %v1415_v0 = vmul.f32 %v2700_v18, %v3473_v16 }
 0x457   : > { %1592 = vmatmul.mubr.f32.gmra.mrb[2].mxu1 %v1429_v62 }
 0x458   : > { %1556 = vmatprep.mubr.f32.mxu0 %v1416_v19 }
 0x459   : > { %v2702_v47 = vpop.eup %2701  ;;  %v1385_v2 = vpop.xlane.xlu1 %1384  ;;  %1557 = vmatmul.mubr.f32.gmra.mrb[4].mxu0 %v1415_v0 }
 0x45a   : > { %2709 = vrcp.f32 %v1385_v2  ;;  %v1432_v56 = vmul.f32 %v2702_v47, %v3487_v5  ;;  %v1431_v17 = vmul.f32 %v2702_v47, %v3485_v20 }
 0x45b   : > { %v2704_v6 = vpop.eup %2703  ;;  %v1364_v42 = vpop.xlane.xlu0 %1363 }
 0x45c   : > { %2711 = vrcp.f32 %v1364_v42  ;;  %v1418_v38 = vmul.f32 %v2704_v6, %v3497_v60  ;;  %1596 = vmatprep.mubr.f32.mxu1 %v1432_v56  ;;  %v1417_v27 = vmul.f32 %v2704_v6, %v3491_v15 }
 0x45d   : > { %v1388_v54 = vpop.xlane.xlu1 %1387  ;;  %1597 = vmatmul.mubr.f32.gmra.mrb[4].mxu1 %v1431_v17 }
 0x45e   : > { %v2706_v16 = vpop.eup %2705  ;;  %2713 = vrcp.f32 %v1388_v54  ;;  %1561 = vmatprep.mubr.f32.mxu0 %v1418_v38 }
 0x45f   : > { %v1367_v55 = vpop.xlane.xlu0 %1366  ;;  %1562 = vmatmul.mubr.f32.gmra.mrb[6].mxu0 %v1417_v27  ;;  %v1434_v35 = vmul.f32 %v2706_v16, %v3505_v12  ;;  %v1433_v5 = vmul.f32 %v2706_v16, %v3501_v37 }
 0x460   : > { %v2708_v20 = vpop.eup %2707  ;;  %2715 = vrcp.f32 %v1367_v55 }
 0x461   : > { %v1391_v40 = vpop.xlane.xlu1 %1390  ;;  %v1420_v59 = vmul.f32 %v2708_v20, %v3513_v8  ;;  %1601 = vmatprep.mubr.f32.mxu1 %v1434_v35  ;;  %v1419_v60 = vmul.f32 %v2708_v20, %v3509_v29 }
 0x462   : > { %2717 = vrcp.f32 %v1391_v40  ;;  %1602 = vmatmul.mubr.f32.gmra.mrb[6].mxu1 %v1433_v5 }
 0x463   : > { %v1370_v15 = vpop.xlane.xlu0 %1369  ;;  %1566 = vmatprep.mubr.f32.mxu0 %v1420_v59 }
 0x464   : > { %v2710_v22 = vpop.eup %2709  ;;  %2719 = vrcp.f32 %v1370_v15  ;;  %1567 = vmatmul.mubr.f32.gmra.mrb[8].mxu0 %v1419_v60 }
 0x465   : > { %v1394_v31 = vpop.xlane.xlu1 %1393  ;;  %v1436_v12 = vmul.f32 %v2710_v22, %v3521_v44  ;;  %v1435_v37 = vmul.f32 %v2710_v22, %v3519_v11 }
 0x466   : > { %v2712_v25 = vpop.eup %2711  ;;  %2721 = vrcp.f32 %v1394_v31 }
 0x467   : > { %v1422_v45 = vmul.f32 %v2712_v25, %v3527_v58  ;;  %1606 = vmatprep.mubr.f32.mxu1 %v1436_v12  ;;  %v1421_v8 = vmul.f32 %v2712_v25, %v3523_v14 }
 0x468   : > { %v2714_v29 = vpop.eup %2713  ;;  %1607 = vmatmul.mubr.f32.gmra.mrb[8].mxu1 %v1435_v37 }
 0x469   : > { %1571 = vmatprep.mubr.f32.mxu0 %v1422_v45  ;;  %v1438_v46 = vmul.f32 %v2714_v29, %v3533_v34  ;;  %v1437_v32 = vmul.f32 %v2714_v29, %v3529_v43 }
 0x46a   : > { %v2716_v30 = vpop.eup %2715  ;;  %1572 = vmatmul.mubr.f32.gmra.mrb[10].mxu0 %v1421_v8 }
 0x46b   : > { %v1424_v44 = vmul.f32 %v2716_v30, %v3539_v28  ;;  %1611 = vmatprep.mubr.f32.mxu1 %v1438_v46  ;;  %v1423_v11 = vmul.f32 %v2716_v30, %v3535_v36 }
 0x46c   : > { %v2718_v3 = vpop.eup %2717  ;;  %1612 = vmatmul.mubr.f32.gmra.mrb[10].mxu1 %v1437_v32 }
 0x46d   : > { %1576 = vmatprep.mubr.f32.mxu0 %v1424_v44  ;;  %v1440_v58 = vmul.f32 %v2718_v3, %v3545_v7  ;;  %v1439_v14 = vmul.f32 %v2718_v3, %v3541_v61 }
 0x46e   : > { %v2720_v1 = vpop.eup %2719  ;;  %1577 = vmatmul.mubr.f32.gmra.mrb[12].mxu0 %v1423_v11 }
 0x46f   : > { %v1426_v34 = vmul.f32 %v2720_v1, %v3551_v63  ;;  %1616 = vmatprep.mubr.f32.mxu1 %v1440_v58  ;;  %v1425_v43 = vmul.f32 %v2720_v1, %v3547_v50  ;;  %v3598_v63 = vld [vmem:[%s385_s29] ss:$0 sm:$0xff] }
 0x470   : > { %v2722_v9 = vpop.eup %2721  ;;  %1617 = vmatmul.mubr.f32.gmra.mrb[12].mxu1 %v1439_v14 }
 0x471   : > { %1581 = vmatprep.mubr.f32.mxu0 %v1426_v34  ;;  %v1442_v36 = vmul.f32 %v2722_v9, %v3557_v26  ;;  %v1441_v28 = vmul.f32 %v2722_v9, %v3553_v13 }
 0x472   : > { %1582 = vmatmul.mubr.f32.gmra.mrb[14].mxu0 %v1425_v43 }
 0x473   : > { %1621 = vmatprep.mubr.f32.mxu1 %v1442_v36 }
 0x474   : > { %1622 = vmatmul.mubr.f32.gmra.mrb[14].mxu1 %v1441_v28 }
 0x51f   : > { %v2266_v7 = vpop.f32.mrb[0].mxu0 }
 0x520   : > { %v2267_v61 = vpop.f32.mrb[1].mxu0 }
 0x521   : > { %v2268_v48 = vadd.f32 %v2267_v61, %v2266_v7 }
 0x523   : > { %v2269_v50 = vpop.f32.mrb[2].mxu0  ;;  %v3601_v51 = vadd.f32 %v2268_v48, %v3598_v63 }
 0x524   : > { %v2270_v49 = vpop.f32.mrb[3].mxu0 }
 0x525   : > { %v2271_v26 = vadd.f32 %v2270_v49, %v2269_v50  ;;  %1627 = vadd.xlane.f32.xlu0 %v3601_v51 }
 0x526   : > { %v2290_v13 = vpop.f32.mrb[0].mxu1 }
 0x527   : > { %v2291_v41 = vpop.f32.mrb[1].mxu1  ;;  %v3605_v23 = vadd.f32 %v2271_v26, %v3598_v63 }
 0x528   : > { %v2292_v39 = vadd.f32 %v2291_v41, %v2290_v13 }
 0x529   : > { %1629 = vadd.xlane.f32.xlu1 %v3605_v23 }
 0x52a   : > { %v2293_v4 = vpop.f32.mrb[2].mxu1  ;;  %v3609_v24 = vadd.f32 %v2292_v39, %v3598_v63 }
 0x52b   : > { %v2294_v52 = vpop.f32.mrb[3].mxu1 }
 0x52c   : > { %v2272_v10 = vpop.f32.mrb[4].mxu0  ;;  %v2295_v21 = vadd.f32 %v2294_v52, %v2293_v4  ;;  %1643 = vadd.xlane.f32.xlu0 %v3609_v24 }
 0x52d   : > { %v2273_v33 = vpop.f32.mrb[5].mxu0 }
 0x52e   : > { %v2274_v53 = vadd.f32 %v2273_v33, %v2272_v10  ;;  %v3613_v62 = vadd.f32 %v2295_v21, %v3598_v63 }
 0x530   : > { %v2296_v18 = vpop.f32.mrb[4].mxu1  ;;  %1645 = vadd.xlane.f32.xlu1 %v3613_v62  ;;  %v3617_v57 = vadd.f32 %v2274_v53, %v3598_v63 }
 0x531   : > { %v2297_v19 = vpop.f32.mrb[5].mxu1 }
 0x532   : > { %v2275_v0 = vpop.f32.mrb[6].mxu0  ;;  %v2298_v47 = vadd.f32 %v2297_v19, %v2296_v18  ;;  %1631 = vadd.xlane.f32.xlu0 %v3617_v57 }
 0x533   : > { %v2276_v2 = vpop.f32.mrb[7].mxu0 }
 0x534   : > { %v2277_v56 = vadd.f32 %v2276_v2, %v2275_v0  ;;  %v3621_v17 = vadd.f32 %v2298_v47, %v3598_v63 }
 0x535   : > { %v2299_v6 = vpop.f32.mrb[6].mxu1 }
 0x536   : > { %v2300_v42 = vpop.f32.mrb[7].mxu1  ;;  %1647 = vadd.xlane.f32.xlu0 %v3621_v17  ;;  %v3625_v38 = vadd.f32 %v2277_v56, %v3598_v63 }
 0x537   : > { %v2278_v27 = vpop.f32.mrb[8].mxu0  ;;  %v2301_v54 = vadd.f32 %v2300_v42, %v2299_v6 }
 0x538   : > { %v2279_v16 = vpop.f32.mrb[9].mxu0  ;;  %1633 = vadd.xlane.f32.xlu1 %v3625_v38 }
 0x539   : > { %v2280_v55 = vadd.f32 %v2279_v16, %v2278_v27  ;;  %v3629_v35 = vadd.f32 %v2301_v54, %v3598_v63 }
 0x53b   : > { %v2302_v5 = vpop.f32.mrb[8].mxu1  ;;  %v3632_v20 = vadd.f32 %v2280_v55, %v3598_v63 }
 0x53c   : > { %v2303_v40 = vpop.f32.mrb[9].mxu1  ;;  %1649 = vadd.xlane.f32.xlu1 %v3629_v35 }
 0x53d   : > { %v2281_v59 = vpop.f32.mrb[10].mxu0  ;;  %v2304_v60 = vadd.f32 %v2303_v40, %v2302_v5  ;;  %1635 = vadd.xlane.f32.xlu0 %v3632_v20 }
 0x53e   : > { %v2282_v15 = vpop.f32.mrb[11].mxu0 }
 0x53f   : > { %v2283_v22 = vadd.f32 %v2282_v15, %v2281_v59  ;;  %v2305_v31 = vpop.f32.mrb[10].mxu1  ;;  %v3637_v12 = vadd.f32 %v2304_v60, %v3598_v63 }
 0x540   : > { %v2306_v37 = vpop.f32.mrb[11].mxu1 }
 0x541   : > { %v2284_v25 = vpop.f32.mrb[12].mxu0  ;;  %v2307_v45 = vadd.f32 %v2306_v37, %v2305_v31  ;;  %1651 = vadd.xlane.f32.xlu0 %v3637_v12  ;;  %v3641_v8 = vadd.f32 %v2283_v22, %v3598_v63 }
 0x542   : > { %v2285_v29 = vpop.f32.mrb[13].mxu0 }
 0x543   : > { %v2286_v46 = vadd.f32 %v2285_v29, %v2284_v25  ;;  %1637 = vadd.xlane.f32.xlu1 %v3641_v8  ;;  %v2308_v32 = vpop.f32.mrb[12].mxu1  ;;  %v3645_v30 = vadd.f32 %v2307_v45, %v3598_v63 }
 0x544   : > { %v2309_v44 = vpop.f32.mrb[13].mxu1 }
 0x545   : > { %v2287_v11 = vpop.f32.mrb[14].mxu0  ;;  %v2310_v3 = vadd.f32 %v2309_v44, %v2308_v32  ;;  %v3648_v58 = vadd.f32 %v2286_v46, %v3598_v63 }
 0x546   : > { %v2288_v14 = vpop.f32.mrb[15].mxu0 }
 0x547   : > { %v2289_v1 = vadd.f32 %v2288_v14, %v2287_v11  ;;  %1653 = vadd.xlane.f32.xlu1 %v3645_v30  ;;  %1639 = vadd.xlane.f32.xlu0 %v3648_v58  ;;  %v2311_v34 = vpop.f32.mrb[14].mxu1  ;;  %v3653_v43 = vadd.f32 %v2310_v3, %v3598_v63 }
 0x548   : > { %v2312_v9 = vpop.f32.mrb[15].mxu1 }
 0x549   : > { %v2313_v36 = vadd.f32 %v2312_v9, %v2311_v34  ;;  %v3656_v28 = vadd.f32 %v2289_v1, %v3598_v63 }
 0x54b   : > { %1655 = vadd.xlane.f32.xlu0 %v3653_v43  ;;  %1641 = vadd.xlane.f32.xlu1 %v3656_v28  ;;  %v3661_v7 = vadd.f32 %v2313_v36, %v3598_v63 }
 0x54f   : > { %1657 = vadd.xlane.f32.xlu1 %v3661_v7 }
 0x5b2   : > { %v1628_v61 = vpop.xlane.xlu0 %1627 }
 0x5b3   : > { %v3664_v48 = vmul.f32 0.03125, %v1628_v61 }
 0x5b5   : > { %v3668_v50 = vsub.f32 %v3601_v51, %v3664_v48 }
 0x5b6   : > { %v1630_v49 = vpop.xlane.xlu1 %1629 }
 0x5b7   : > { %v3670_v26 = vmul.f32 0.03125, %v1630_v49  ;;  %v1691_v13 = vmul.f32 %v3668_v50, %v3668_v50 }
 0x5b9   : > { %v1644_v41 = vpop.xlane.xlu0 %1643  ;;  %1707 = vadd.xlane.f32.xlu0 %v1691_v13  ;;  %v3676_v63 = vsub.f32 %v3605_v23, %v3670_v26 }
 0x5ba   : > { %v3678_v39 = vmul.f32 0.03125, %v1644_v41  ;;  %v1740_v41 = vmul.f32 96.0, %v3670_v26 }
 0x5bb   : > { %v1692_v4 = vmul.f32 %v3676_v63, %v3676_v63 }
 0x5bc   : > { %v3684_v51 = vsub.f32 %v3609_v24, %v3678_v39 }
 0x5bd   : > { %v1646_v52 = vpop.xlane.xlu1 %1645  ;;  %1709 = vadd.xlane.f32.xlu1 %v1692_v4 }
 0x5be   : > { %v3686_v10 = vmul.f32 0.03125, %v1646_v52  ;;  %v1699_v21 = vmul.f32 %v3684_v51, %v3684_v51 }
 0x5bf   : > { %v1632_v33 = vpop.xlane.xlu0 %1631 }
 0x5c0   : > { %v3690_v53 = vmul.f32 0.03125, %v1632_v33  ;;  %1723 = vadd.xlane.f32.xlu0 %v1699_v21  ;;  %v3694_v23 = vsub.f32 %v3613_v62, %v3686_v10  ;;  %v1747_v21 = vmul.f32 96.0, %v3678_v39 }
 0x5c2   : > { %v1700_v18 = vmul.f32 %v3694_v23, %v3694_v23  ;;  %v3700_v24 = vsub.f32 %v3617_v57, %v3690_v53 }
 0x5c3   : > { %v1648_v19 = vpop.xlane.xlu0 %1647 }
 0x5c4   : > { %v3702_v0 = vmul.f32 0.03125, %v1648_v19  ;;  %1725 = vadd.xlane.f32.xlu1 %v1700_v18  ;;  %v1693_v47 = vmul.f32 %v3700_v24, %v3700_v24  ;;  %v1756_v18 = vmul.f32 %v1740_v41, %v3670_v26 }
 0x5c5   : > { %v1634_v2 = vpop.xlane.xlu1 %1633 }
 0x5c6   : > { %v3706_v56 = vmul.f32 0.03125, %v1634_v2  ;;  %1711 = vadd.xlane.f32.xlu0 %v1693_v47  ;;  %v3710_v62 = vsub.f32 %v3621_v17, %v3702_v0  ;;  %v1763_v2 = vmul.f32 %v1747_v21, %v3678_v39  ;;  %v1749_v39 = vmul.f32 96.0, %v3702_v0 }
 0x5c8   : > { %v3714_v6 = vsub.f32 %v3625_v38, %v3706_v56  ;;  %v1701_v57 = vmul.f32 %v3710_v62, %v3710_v62 }
 0x5c9   : > { %v1650_v42 = vpop.xlane.xlu1 %1649 }
 0x5ca   : > { %v3718_v27 = vmul.f32 0.03125, %v1650_v42  ;;  %v1636_v54 = vpop.xlane.xlu0 %1635  ;;  %v1694_v16 = vmul.f32 %v3714_v6, %v3714_v6  ;;  %1727 = vadd.xlane.f32.xlu0 %v1701_v57  ;;  %v1748_v57 = vmul.f32 96.0, %v3686_v10 }
 0x5cb   : > { %v3722_v55 = vmul.f32 0.03125, %v1636_v54 }
 0x5cc   : > { %1713 = vadd.xlane.f32.xlu1 %v1694_v16  ;;  %v3726_v17 = vsub.f32 %v3629_v35, %v3718_v27  ;;  %v1741_v16 = vmul.f32 96.0, %v3690_v53 }
 0x5cd   : > { %v3730_v38 = vsub.f32 %v3632_v20, %v3722_v55 }
 0x5ce   : > { %v1652_v5 = vpop.xlane.xlu0 %1651  ;;  %v1702_v40 = vmul.f32 %v3726_v17, %v3726_v17 }
 0x5cf   : > { %v3734_v59 = vmul.f32 0.03125, %v1652_v5  ;;  %v1695_v60 = vmul.f32 %v3730_v38, %v3730_v38 }
 0x5d0   : > { %v1638_v15 = vpop.xlane.xlu1 %1637  ;;  %1729 = vadd.xlane.f32.xlu1 %v1702_v40 }
 0x5d1   : > { %v3738_v22 = vmul.f32 0.03125, %v1638_v15  ;;  %1715 = vadd.xlane.f32.xlu0 %v1695_v60  ;;  %v3742_v35 = vsub.f32 %v3637_v12, %v3734_v59  ;;  %v1764_v60 = vmul.f32 %v1748_v57, %v3686_v10  ;;  %v1765_v10 = vmul.f32 %v1749_v39, %v3702_v0  ;;  %v3819_v0 = vld [vmem:[%s391_s23] ss:$0 sm:$0xff] }
 0x5d3   : > { %v3746_v20 = vsub.f32 %v3641_v8, %v3738_v22  ;;  %v1703_v31 = vmul.f32 %v3742_v35, %v3742_v35 }
 0x5d4   : > { %v1654_v37 = vpop.xlane.xlu1 %1653  ;;  %v1640_v25 = vpop.xlane.xlu0 %1639 }
 0x5d5   : > { %v3750_v45 = vmul.f32 0.03125, %v1654_v37  ;;  %v3752_v29 = vmul.f32 0.03125, %v1640_v25  ;;  %v1696_v46 = vmul.f32 %v3746_v20, %v3746_v20  ;;  %1731 = vadd.xlane.f32.xlu0 %v1703_v31  ;;  %v1757_v37 = vmul.f32 %v1741_v16, %v3690_v53 }
 0x5d7   : > { %1717 = vadd.xlane.f32.xlu1 %v1696_v46  ;;  %v3758_v12 = vsub.f32 %v3645_v30, %v3750_v45  ;;  %v3762_v8 = vsub.f32 %v3648_v58, %v3752_v29  ;;  %v1742_v46 = vmul.f32 96.0, %v3706_v56 }
 0x5d8   : > { %v1642_v32 = vpop.xlane.xlu1 %1641  ;;  %v1656_v44 = vpop.xlane.xlu0 %1655 }
 0x5d9   : > { %v3764_v11 = vmul.f32 0.03125, %v1642_v32  ;;  %v3766_v3 = vmul.f32 0.03125, %v1656_v44  ;;  %v1704_v14 = vmul.f32 %v3758_v12, %v3758_v12  ;;  %v1697_v1 = vmul.f32 %v3762_v8, %v3762_v8 }
 0x5da   : > { %v1758_v53 = vmul.f32 %v1742_v46, %v3706_v56 }
 0x5db   : > { %1733 = vadd.xlane.f32.xlu1 %v1704_v14  ;;  %1719 = vadd.xlane.f32.xlu0 %v1697_v1  ;;  %v3774_v30 = vsub.f32 %v3656_v28, %v3764_v11  ;;  %v3778_v58 = vsub.f32 %v3653_v43, %v3766_v3  ;;  %v1739_v43 = vmul.f32 96.0, %v3664_v48 }
 0x5dc   : > { %v1658_v34 = vpop.xlane.xlu1 %1657 }
 0x5dd   : > { %v3780_v9 = vmul.f32 0.03125, %v1658_v34  ;;  %v1698_v36 = vmul.f32 %v3774_v30, %v3774_v30  ;;  %v1705_v61 = vmul.f32 %v3778_v58, %v3778_v58  ;;  %v1755_v13 = vmul.f32 %v1739_v43, %v3664_v48 }
 0x5df   : > { %1721 = vadd.xlane.f32.xlu1 %v1698_v36  ;;  %1735 = vadd.xlane.f32.xlu0 %v1705_v61  ;;  %v3788_v49 = vsub.f32 %v3661_v7, %v3780_v9  ;;  %v3810_v36 = vld [vmem:[%s388_s14] ss:$0 sm:$0xff] }
 0x5e1   : > { %v1706_v28 = vmul.f32 %v3788_v49, %v3788_v49 }
 0x5e3   : > { %1737 = vadd.xlane.f32.xlu1 %v1706_v28 }
 0x646   : > { %v1708_v4 = vpop.xlane.xlu0 %1707 }
 0x647   : > { %v1771_v52 = vsub.f32 %v1708_v4, %v1755_v13  ;;  %v1750_v4 = vmul.f32 96.0, %v3718_v27 }
 0x649   : > { %v1787_v33 = vmul.f32 0.03125, %v1771_v52  ;;  %v1743_v52 = vmul.f32 96.0, %v3722_v55 }
 0x64a   : > { %v1710_v19 = vpop.xlane.xlu1 %1709 }
 0x64b   : > { %v1803_v7 = vadd.f32 1e-05, %v1787_v33  ;;  %v1772_v47 = vsub.f32 %v1710_v19, %v1756_v18 }
 0x64d   : > { %2723 = vrsqrt.f32 %v1803_v7  ;;  %v1788_v42 = vmul.f32 0.03125, %v1772_v47  ;;  %v1724_v54 = vpop.xlane.xlu0 %1723 }
 0x64e   : > { %v1779_v48 = vsub.f32 %v1724_v54, %v1763_v2  ;;  %v1766_v2 = vmul.f32 %v1750_v4, %v3718_v27  ;;  %v1751_v54 = vmul.f32 96.0, %v3734_v59 }
 0x64f   : > { %v1804_v5 = vadd.f32 1e-05, %v1788_v42  ;;  %v1759_v42 = vmul.f32 %v1743_v52, %v3722_v55  ;;  %v1744_v55 = vmul.f32 96.0, %v3738_v22 }
 0x650   : > { %v1795_v40 = vmul.f32 0.03125, %v1779_v48  ;;  %v1767_v46 = vmul.f32 %v1751_v54, %v3734_v59 }
 0x651   : > { %2725 = vrsqrt.f32 %v1804_v5  ;;  %v1726_v26 = vpop.xlane.xlu1 %1725 }
 0x652   : > { %v1811_v15 = vadd.f32 1e-05, %v1795_v40  ;;  %v1780_v31 = vsub.f32 %v1726_v26, %v1764_v60 }
 0x653   : > { %v1712_v25 = vpop.xlane.xlu0 %1711 }
 0x654   : > { %2727 = vrsqrt.f32 %v1811_v15  ;;  %v1796_v32 = vmul.f32 0.03125, %v1780_v31  ;;  %v1773_v44 = vsub.f32 %v1712_v25, %v1757_v37 }
 0x656   : > { %v1812_v14 = vadd.f32 1e-05, %v1796_v32  ;;  %v1789_v1 = vmul.f32 0.03125, %v1773_v44  ;;  %v1752_v44 = vmul.f32 96.0, %v3750_v45 }
 0x657   : > { %v2724_v34 = vpop.eup %2723  ;;  %v1728_v61 = vpop.xlane.xlu0 %1727 }
 0x658   : > { %v1835_v28 = vmul.f32 %v2724_v34, %v3668_v50  ;;  %2729 = vrsqrt.f32 %v1812_v14  ;;  %v1805_v43 = vadd.f32 1e-05, %v1789_v1  ;;  %v1781_v13 = vsub.f32 %v1728_v61, %v1765_v10 }
 0x659   : > { %v1714_v41 = vpop.xlane.xlu1 %1713  ;;  %v1745_v14 = vmul.f32 96.0, %v3752_v29 }
 0x65a   : > { %v1858_v21 = vmul.f32 %v3810_v36, %v1835_v28  ;;  %2731 = vrsqrt.f32 %v1805_v43  ;;  %v1774_v56 = vsub.f32 %v1714_v41, %v1758_v53  ;;  %v1797_v33 = vmul.f32 0.03125, %v1781_v13 }
 0x65b   : > { %v2726_v50 = vpop.eup %2725  ;;  %v1760_v28 = vmul.f32 %v1744_v55, %v3738_v22  ;;  %v1746_v13 = vmul.f32 96.0, %v3764_v11 }
 0x65c   : > { %v3825_v18 = vadd.f32 %v3819_v0, %v1858_v21  ;;  %v1836_v19 = vmul.f32 %v2726_v50, %v3676_v63  ;;  %v1790_v7 = vmul.f32 0.03125, %v1774_v56  ;;  %v1813_v47 = vadd.f32 1e-05, %v1797_v33 }
 0x65d   : > { %v1730_v57 = vpop.xlane.xlu1 %1729  ;;  %v1768_v33 = vmul.f32 %v1752_v44, %v3750_v45  ;;  %v1761_v50 = vmul.f32 %v1745_v14, %v3752_v29 }
 0x65e   : > { %v2728_v48 = vpop.eup %2727  ;;  %v1897_v16 = vmax.f32 %v3825_v18, 0.0  ;;  %v1859_v5 = vmul.f32 %v3810_v36, %v1836_v19  ;;  %v1806_v40 = vadd.f32 1e-05, %v1790_v7  ;;  %2733 = vrsqrt.f32 %v1813_v47  ;;  %v1716_v60 = vpop.xlane.xlu0 %1715 }
 0x65f   : > { %v1843_v63 = vmul.f32 %v2728_v48, %v3684_v51  ;;  %v1782_v26 = vsub.f32 %v1730_v57, %v1766_v2  ;;  %v1775_v15 = vsub.f32 %v1716_v60, %v1759_v42  ;;  %v1762_v57 = vmul.f32 %v1746_v13, %v3764_v11 }
 0x660   : > { %1914 = vst [vmem:[%s3836_s13] sm:$0xff] %v1897_v16  ;;  %v3842_v27 = vadd.f32 %v3819_v0, %v1859_v5  ;;  %2735 = vrsqrt.f32 %v1806_v40  ;;  %v1753_v42 = vmul.f32 96.0, %v3766_v3 }
 0x661   : > { %v1866_v31 = vmul.f32 %v3810_v36, %v1843_v63  ;;  %v1798_v37 = vmul.f32 0.03125, %v1782_v26  ;;  %v1791_v51 = vmul.f32 0.03125, %v1775_v15  ;;  %v1754_v63 = vmul.f32 96.0, %v3780_v9 }
 0x662   : > { %v2730_v39 = vpop.eup %2729  ;;  %v1898_v25 = vmax.f32 %v3842_v27, 0.0  ;;  %v1732_v32 = vpop.xlane.xlu0 %1731 }
 0x663   : > { %v3851_v1 = vadd.f32 %v3819_v0, %v1866_v31  ;;  %v1844_v10 = vmul.f32 %v2730_v39, %v3694_v23  ;;  %v1814_v34 = vadd.f32 1e-05, %v1798_v37  ;;  %v1807_v53 = vadd.f32 1e-05, %v1791_v51 }
 0x664   : > { %v2732_v61 = vpop.eup %2731  ;;  %1915 = vst [vmem:[%s3836_s13 + $0x8] sm:$0xff] %v1898_v25  ;;  %v1718_v59 = vpop.xlane.xlu1 %1717  ;;  %v1783_v43 = vsub.f32 %v1732_v32, %v1767_v46  ;;  %v1769_v37 = vmul.f32 %v1753_v42, %v3766_v3 }
 0x665   : > { %v1905_v41 = vmax.f32 %v3851_v1, 0.0  ;;  %v1867_v4 = vmul.f32 %v3810_v36, %v1844_v10  ;;  %v1837_v52 = vmul.f32 %v2732_v61, %v3700_v24  ;;  %2737 = vrsqrt.f32 %v1814_v34  ;;  %v1934_v1 = vld [vmem:[%s3993_s8] sm:$0xff] (!%p2148_p12) }
 0x666   : > { %2739 = vrsqrt.f32 %v1807_v53  ;;  %v1776_v23 = vsub.f32 %v1718_v59, %v1760_v28  ;;  %v1799_v21 = vmul.f32 0.03125, %v1783_v43  ;;  %v1770_v10 = vmul.f32 %v1754_v63, %v3780_v9 }
 0x667   : > { %1922 = vst [vmem:[%s3836_s13 + $0x40] sm:$0xff] %v1905_v41  ;;  %v3866_v56 = vadd.f32 %v3819_v0, %v1867_v4  ;;  %v1860_v22 = vmul.f32 %v3810_v36, %v1837_v52 }
 0x668   : > { %v2734_v19 = vpop.eup %2733  ;;  %v1792_v7 = vmul.f32 0.03125, %v1776_v23  ;;  %v1815_v24 = vadd.f32 1e-05, %v1799_v21  ;;  %v1734_v47 = vpop.xlane.xlu1 %1733 }
 0x669   : > { %v1720_v2 = vpop.xlane.xlu0 %1719  ;;  %v1906_v54 = vmax.f32 %v3866_v56, 0.0  ;;  %v3875_v48 = vadd.f32 %v3819_v0, %v1860_v22  ;;  %v1845_v5 = vmul.f32 %v2734_v19, %v3710_v62  ;;  %v1784_v45 = vsub.f32 %v1734_v47, %v1768_v33 }
 0x66a   : > { %v2736_v29 = vpop.eup %2735  ;;  %v1808_v40 = vadd.f32 1e-05, %v1792_v7  ;;  %2741 = vrsqrt.f32 %v1815_v24  ;;  %v1777_v60 = vsub.f32 %v1720_v2, %v1761_v50 }
 0x66b   : > { %1923 = vst [vmem:[%s3836_s13 + $0x48] sm:$0xff] %v1906_v54  ;;  %v1899_v11 = vmax.f32 %v3875_v48, 0.0  ;;  %v1838_v26 = vmul.f32 %v2736_v29, %v3714_v6  ;;  %v1868_v15 = vmul.f32 %v3810_v36, %v1845_v5  ;;  %v1800_v55 = vmul.f32 0.03125, %v1784_v45 }
 0x66c   : > { %2743 = vrsqrt.f32 %v1808_v40  ;;  %v1793_v62 = vmul.f32 0.03125, %v1777_v60  ;;  %v1722_v31 = vpop.xlane.xlu1 %1721 }
 0x66d   : > { %v1736_v51 = vpop.xlane.xlu0 %1735  ;;  %1916 = vst [vmem:[%s3836_s13 + $0x10] sm:$0xff] %v1899_v11  ;;  %v1861_v39 = vmul.f32 %v3810_v36, %v1838_v26  ;;  %v3891_v46 = vadd.f32 %v3819_v0, %v1868_v15  ;;  %v1816_v32 = vadd.f32 1e-05, %v1800_v55  ;;  %v1778_v6 = vsub.f32 %v1722_v31, %v1762_v57 }
 0x66e   : > { %v1809_v44 = vadd.f32 1e-05, %v1793_v62  ;;  %v1785_v14 = vsub.f32 %v1736_v51, %v1769_v37 }
 0x66f   : > { %v2738_v34 = vpop.eup %2737  ;;  %v3895_v53 = vadd.f32 %v3819_v0, %v1861_v39  ;;  %v1907_v3 = vmax.f32 %v3891_v46, 0.0  ;;  %2745 = vrsqrt.f32 %v1816_v32  ;;  %v1794_v61 = vmul.f32 0.03125, %v1778_v6 }
 0x670   : > { %v2740_v28 = vpop.eup %2739  ;;  %v1846_v59 = vmul.f32 %v2738_v34, %v3726_v17  ;;  %2747 = vrsqrt.f32 %v1809_v44  ;;  %v1801_v43 = vmul.f32 0.03125, %v1785_v14  ;;  %v1738_v13 = vpop.xlane.xlu1 %1737 }
 0x671   : > { %v1900_v4 = vmax.f32 %v3895_v53, 0.0  ;;  %1924 = vst [vmem:[%s3836_s13 + $0x50] sm:$0xff] %v1907_v3  ;;  %v1839_v9 = vmul.f32 %v2740_v28, %v3730_v38  ;;  %v1810_v52 = vadd.f32 1e-05, %v1794_v61  ;;  %v1786_v23 = vsub.f32 %v1738_v13, %v1770_v10 }
 0x672   : > { %v1869_v21 = vmul.f32 %v3810_v36, %v1846_v59  ;;  %v1817_v22 = vadd.f32 1e-05, %v1801_v43 }
 0x673   : > { %1917 = vst [vmem:[%s3836_s13 + $0x18] sm:$0xff] %v1900_v4  ;;  %v1862_v17 = vmul.f32 %v3810_v36, %v1839_v9  ;;  %2749 = vrsqrt.f32 %v1810_v52  ;;  %v1802_v33 = vmul.f32 0.03125, %v1786_v23  ;;  %v2799_v9 = vmov (!%p2148_p12), 0.0|0.0  }
 0x674   : > { %v2742_v50 = vpop.eup %2741  ;;  %v3910_v19 = vadd.f32 %v3819_v0, %v1869_v21  ;;  %2751 = vrsqrt.f32 %v1817_v22  ;;  %2542 = vmatprep.subr.bf16.mxu0 (!%p2148_p12), %v2799_v9 }
 0x675   : > { %v1885_v38 = vadd.f32 %v3819_v0, %v1862_v17  ;;  %v1847_v7 = vmul.f32 %v2742_v50, %v3742_v35  ;;  %v1818_v24 = vadd.f32 1e-05, %v1802_v33 }
 0x676   : > { %v2744_v47 = vpop.eup %2743  ;;  %v1908_v2 = vmax.f32 %v3910_v19, 0.0 }
 0x677   : > { %v1901_v57 = vmax.f32 %v1885_v38, 0.0  ;;  %v1840_v42 = vmul.f32 %v2744_v47, %v3746_v20  ;;  %v1870_v5 = vmul.f32 %v3810_v36, %v1847_v7  ;;  %2753 = vrsqrt.f32 %v1818_v24 }
 0x678   : > { %1925 = vst [vmem:[%s3836_s13 + $0x58] sm:$0xff] %v1908_v2  ;;  %v2558_v27 = vpack.c.bf16 (!%p2148_p12), %v1908_v2, %v1907_v3 }
 0x679   : > { %v2746_v45 = vpop.eup %2745  ;;  %1918 = vst [vmem:[%s3836_s13 + $0x20] sm:$0xff] %v1901_v57  ;;  %v1863_v29 = vmul.f32 %v3810_v36, %v1840_v42  ;;  %v1893_v35 = vadd.f32 %v3819_v0, %v1870_v5 }
 0x67a   : > { %v2748_v40 = vpop.eup %2747  ;;  %v1848_v60 = vmul.f32 %v2746_v45, %v3758_v12 }
 0x67b   : > { %v1886_v63 = vadd.f32 %v3819_v0, %v1863_v29  ;;  %v1909_v20 = vmax.f32 %v1893_v35, 0.0  ;;  %v1841_v26 = vmul.f32 %v2748_v40, %v3762_v8 }
 0x67c   : > { %v1871_v15 = vmul.f32 %v3810_v36, %v1848_v60 }
 0x67d   : > { %v2750_v55 = vpop.eup %2749  ;;  %v1902_v62 = vmax.f32 %v1886_v63, 0.0  ;;  %1926 = vst [vmem:[%s3836_s13 + $0x60] sm:$0xff] %v1909_v20  ;;  %v1864_v31 = vmul.f32 %v3810_v36, %v1841_v26 }
 0x67e   : > { %v2752_v37 = vpop.eup %2751  ;;  %v1894_v51 = vadd.f32 %v3819_v0, %v1871_v15  ;;  %v1842_v39 = vmul.f32 %v2750_v55, %v3774_v30 }
 0x67f   : > { %1919 = vst [vmem:[%s3836_s13 + $0x28] sm:$0xff] %v1902_v62  ;;  %v1887_v12 = vadd.f32 %v3819_v0, %v1864_v31  ;;  %v1849_v8 = vmul.f32 %v2752_v37, %v3778_v58  ;;  %v2549_v52 = vpack.c.bf16 (!%p2148_p12), %v1902_v62, %v1901_v57 }
 0x680   : > { %v1910_v32 = vmax.f32 %v1894_v51, 0.0  ;;  %v1865_v6 = vmul.f32 %v3810_v36, %v1842_v39 }
 0x681   : > { %v2754_v44 = vpop.eup %2753  ;;  %v1903_v14 = vmax.f32 %v1887_v12, 0.0  ;;  %v1872_v10 = vmul.f32 %v3810_v36, %v1849_v8 }
 0x682   : > { %1927 = vst [vmem:[%s3836_s13 + $0x68] sm:$0xff] %v1910_v32  ;;  %v1888_v34 = vadd.f32 %v3819_v0, %v1865_v6  ;;  %v1850_v30 = vmul.f32 %v2754_v44, %v3788_v49  ;;  %v2543_v49 = vpack.c.bf16 (!%p2148_p12), %v1898_v25, %v1897_v16  ;;  %v2555_v16 = vpack.c.bf16 (!%p2148_p12), %v1906_v54, %v1905_v41 }
 0x683   : > { %1920 = vst [vmem:[%s3836_s13 + $0x30] sm:$0xff] %v1903_v14  ;;  %v1895_v61 = vadd.f32 %v3819_v0, %v1872_v10  ;;  %v2561_v25 = vpack.c.bf16 (!%p2148_p12), %v1910_v32, %v1909_v20 }
 0x684   : > { %v1904_v28 = vmax.f32 %v1888_v34, 0.0  ;;  %v1873_v58 = vmul.f32 %v3810_v36, %v1850_v30  ;;  %1933 = sbr.rel (%p2148_p12) target bundleno = 1914 (0x77a), region = 95  ;;  %2544 = vmatpush3.bf16.msra.mxu0 (!%p2148_p12), %v2543_v49  ;;  %v2546_v36 = vpack.c.bf16 (!%p2148_p12), %v1900_v4, %v1899_v11  ;;  %v1935_v11 = vld [vmem:[%s2922_s11] sm:$0xff] (!%p2148_p12) }
 0x685   : > { %v1911_v59 = vmax.f32 %v1895_v61, 0.0  ;;  %2545 = vmatprep.subr.bf16.mxu0 (!%p2148_p12), %v2799_v9 }
 0x686   : > { %1921 = vst [vmem:[%s3836_s13 + $0x38] sm:$0xff] %v1904_v28  ;;  %v1896_v43 = vadd.f32 %v3819_v0, %v1873_v58  ;;  %v2801_v0 = vmov (!%p2148_p12), 0.0   ;;  %v2552_v18 = vpack.c.bf16 (!%p2148_p12), %v1904_v28, %v1903_v14 }
 0x687   : > { %1928 = vst [vmem:[%s3836_s13 + $0x70] sm:$0xff] %v1911_v59  ;;  %2443 = vmatprep.mubr.msk.f32.mxu0 (!%p2148_p12), %vm2800_vm1, %v2801_v0 }
 0x688   : > { %v1912_v13 = vmax.f32 %v1896_v43, 0.0  ;;  %2547 = vmatpush3.bf16.msra.mxu0 (!%p2148_p12), %v2546_v36 }
 0x689   : > { %2548 = vmatprep.subr.bf16.mxu0 (!%p2148_p12), %v2799_v9 }
 0x68a   : > { %1929 = vst [vmem:[%s3836_s13 + $0x78] sm:$0xff] %v1912_v13  ;;  %v2564_v48 = vpack.c.bf16 (!%p2148_p12), %v1912_v13, %v1911_v59 }
 0x68c   : > { %2550 = vmatpush3.bf16.msra.mxu0 %v2549_v52 }
 0x68d   : > { %2551 = vmatprep.subr.bf16.mxu0 %v2799_v9 }
 0x690   : > { %2553 = vmatpush3.bf16.msra.mxu0 %v2552_v18 }
 0x691   : > { %2554 = vmatprep.subr.bf16.mxu0 %v2799_v9 }
 0x694   : > { %2556 = vmatpush3.bf16.msra.mxu0 %v2555_v16 }
 0x695   : > { %2557 = vmatprep.subr.bf16.mxu0 %v2799_v9 }
 0x698   : > { %2559 = vmatpush3.bf16.msra.mxu0 %v2558_v27 }
 0x699   : > { %2560 = vmatprep.subr.bf16.mxu0 %v2799_v9 }
 0x69c   : > { %2562 = vmatpush3.bf16.msra.mxu0 %v2561_v25 }
 0x69d   : > { %2563 = vmatprep.subr.bf16.mxu0 %v2799_v9 }
 0x6a0   : > { %2565 = vmatpush3.bf16.msra.mxu0 %v2564_v48 }
 0x6a3   : > { %2444 = vmatmul.mubr.f32.vlgmr.msra.gmra.mrb[0].mxu0 %v1935_v11 }
 0x776   : > { %v2002_v41 = vpop.f32.mrb[0].mxu0 }
 0x777   : > { %v2006_v56 = vadd.f32 %v2002_v41, %v1934_v1  ;;  %v2445_v54 = vpop.f32.mrb[1].mxu0 }
 0x779   : > { %2007 = vst [vmem:[%s3993_s8] sm:$0xff] %v2006_v56 }
 0x77a PF: > { %s18_s9 = sadd.s32 1, %s2795_s9   ;;  %s4002_s27 = sld [smem:[#allocation8_spill]] }
 0x77b   : > { %p15_p13 = scmp.ge.s32.totalorder %s18_s9, 8   ;;  %s4003_s28 = sld [smem:[#allocation9_spill]] }
 0x77c   : > { %s4004_s29 = sld [smem:[#allocation10_spill]]  ;;  %s4005_s30 = sld [smem:[#allocation11_spill]] }
 0x77d   :  { %17 = sbr.rel (!%p15_p13) target bundleno = 3 (0x3), region = 149 }

</bundles_post_ra>
